<compile_context>
chip_gen: v7x
topology: tpu7x:2x2x1
jax: 0.10.0
libtpu: 0.0.40
codegen_flags: <defaults>
</compile_context>

<pallas_src>
import functools

import jax
import jax.numpy as jnp
import numpy as np
from jax.experimental import pallas as pl
from jax.experimental.pallas import tpu as pltpu


def _pool_channels(colsum, C, W):
    """colsum: (1, W*C) -> (1, C), summing the W lane-groups per channel.

    Uses log2(W) circular lane rolls (XLU) when W is a power of two; falls
    back to W static lane-slice adds otherwise.
    """
    if W & (W - 1) == 0:
        s = colsum
        shift = C
        while shift < W * C:
            s = s + pltpu.roll(s, shift=shift, axis=1)
            shift *= 2
        return s[:, :C]
    s = colsum[:, :C]
    for xg in range(1, W):
        s = s + colsum[:, xg * C:(xg + 1) * C]
    return s


def rcab_kernel(x_ref, t1_ref, b1_ref, t2_ref, b2_ref,
                wdT_ref, bd_ref, wuf_ref, buf_ref, out_ref,
                *, H, W, C, res_scale):
    WC = W * C
    x = x_ref[...]                                   # (H, W*C) f32, lane-dense

    def conv3x3(v_f32, t_ref, bias_row):
        """3x3 SAME conv in the folded (H, W*C) layout.

        One bf16 matmul per row offset dy against a block-tridiagonal
        (W*C, W*C) weight; the band structure applies the W-axis taps and
        the zero x-padding, so no im2col slab / lane shifts are needed.
        """
        v = v_f32.astype(jnp.bfloat16)
        zrow = jnp.zeros((1, WC), jnp.bfloat16)
        vu = jnp.concatenate([zrow, v[:H - 1]], axis=0)   # source row y-1
        vd = jnp.concatenate([v[1:], zrow], axis=0)       # source row y+1
        acc = jnp.dot(vu, t_ref[0], preferred_element_type=jnp.float32)
        acc += jnp.dot(v, t_ref[1], preferred_element_type=jnp.float32)
        acc += jnp.dot(vd, t_ref[2], preferred_element_type=jnp.float32)
        return acc + bias_row                             # f32

    # ---- conv1 (+ReLU), conv2 ----------------------------------------------
    h1 = jnp.maximum(conv3x3(x, t1_ref, b1_ref[...]), 0.0)     # (H, W*C)
    h2 = conv3x3(h1, t2_ref, b2_ref[...])                      # (H, W*C)

    # ---- channel attention: GAP -> 1x1 squeeze -> ReLU -> 1x1 expand -------
    colsum = jnp.sum(h2, axis=0, keepdims=True)                # (1, W*C)
    pooled = _pool_channels(colsum, C, W) * (1.0 / (H * W))    # (1, C)
    # Squeeze/excite on the VPU (broadcast-multiply + reduce), no M=1 matmul.
    y = jnp.maximum(
        jnp.sum(wdT_ref[...] * pooled, axis=1, keepdims=True) + bd_ref[...],
        0.0)                                                   # (Csq, 1)
    att = jax.nn.sigmoid(
        jnp.sum(y * wuf_ref[...], axis=0, keepdims=True) + buf_ref[...])  # (1, W*C)

    # ---- attention apply + residual (all f32, lane-dense store) ------------
    out_ref[...] = h2 * att * res_scale + x


def _toeplitz_conv_weights(w_hwio, W):
    """(3, 3, C, C) HWIO -> (3, W*C, W*C) block-tridiagonal bf16 matrices.

    T[dy][x_src*C + ci, x_dst*C + co] = w[dy, x_src - x_dst + 1, ci, co]
    inside the band (zero outside), so summing `row(y+dy-1) @ T[dy]` over dy
    reproduces the SAME-padded 3x3 conv in the folded (H, W*C) layout.
    """
    ts = []
    for dy in range(3):
        t = sum(jnp.kron(jnp.eye(W, k=1 - dx, dtype=w_hwio.dtype),
                         w_hwio[dy, dx])
                for dx in range(3))
        ts.append(t)
    return jnp.stack(ts).astype(jnp.bfloat16)


def rcab_forward(x_nchw, w1, b1, w2, b2, wd, bd, wu, bu, res_scale=1.0):
    B, C, H, W = x_nchw.shape
    csq = wd.shape[1]
    WC = W * C

    # Fold (H, W, C) -> (H, W*C): lane-dense last dim.
    x_f = jnp.transpose(x_nchw, (0, 2, 3, 1)).astype(jnp.float32).reshape(B, H, WC)

    t1 = _toeplitz_conv_weights(w1.astype(jnp.float32), W)        # (3, WC, WC) bf16
    t2 = _toeplitz_conv_weights(w2.astype(jnp.float32), W)
    b1f = jnp.tile(b1.reshape(1, C).astype(jnp.float32), (1, W))  # (1, WC)
    b2f = jnp.tile(b2.reshape(1, C).astype(jnp.float32), (1, W))
    wdT = jnp.transpose(wd).astype(jnp.float32)                   # (csq, C)
    bd_c = bd.reshape(csq, 1).astype(jnp.float32)                 # (csq, 1)
    wuf = jnp.tile(wu.astype(jnp.float32), (1, W))                # (csq, WC)
    buf = jnp.tile(bu.reshape(1, C).astype(jnp.float32), (1, W))  # (1, WC)

    kern = functools.partial(rcab_kernel, H=H, W=W, C=C,
                             res_scale=float(res_scale))

    # Explicit scoped-VMEM budget: 2x in block + 2x out block (double
    # buffering), both Toeplitz weight stacks, and in-kernel temporaries.
    block_bytes = H * WC * 4
    weight_bytes = (t1.size + t2.size) * 2
    vmem_limit = min(int(4 * block_bytes + 2 * weight_bytes
                         + 12 * block_bytes + (4 << 20)),
                     64 << 20)

    const = lambda shape: pl.BlockSpec(shape, lambda b: (0,) * len(shape))

    out_f = pl.pallas_call(
        kern,
        out_shape=jax.ShapeDtypeStruct((B, H, WC), jnp.float32),
        grid_spec=pltpu.PrefetchScalarGridSpec(
            num_scalar_prefetch=0,
            grid=(B,),
            in_specs=[
                pl.BlockSpec((None, H, WC), lambda b: (b, 0, 0)),  # x (B squeezed)
                const((3, WC, WC)),   # conv1 Toeplitz weights
                const((1, WC)),       # conv1 bias (folded)
                const((3, WC, WC)),   # conv2 Toeplitz weights
                const((1, WC)),       # conv2 bias (folded)
                const((csq, C)),      # squeeze weight, transposed
                const((csq, 1)),      # squeeze bias (column)
                const((csq, WC)),     # expand weight, tiled to folded lanes
                const((1, WC)),       # expand bias (folded)
            ],
            out_specs=pl.BlockSpec((None, H, WC), lambda b: (b, 0, 0)),
        ),
        compiler_params=pltpu.CompilerParams(
            dimension_semantics=("parallel",),
            vmem_limit_bytes=vmem_limit),
    )(x_f, t1, b1f, t2, b2f, wdT, bd_c, wuf, buf)

    return jnp.transpose(out_f.reshape(B, H, W, C), (0, 3, 1, 2))


def rcab_reference(x_nchw, w1, b1, w2, b2, wd, bd, wu, bu, res_scale=1.0):
    """Pure-JAX reference (XLA convs) for correctness checking."""
    x = jnp.transpose(x_nchw, (0, 2, 3, 1)).astype(jnp.float32)
    dn = ('NHWC', 'HWIO', 'NHWC')
    h1 = jax.lax.conv_general_dilated(x, w1, (1, 1), 'SAME',
                                      dimension_numbers=dn) + b1.reshape(1, 1, 1, -1)
    h1 = jnp.maximum(h1, 0.0)
    h2 = jax.lax.conv_general_dilated(h1, w2, (1, 1), 'SAME',
                                      dimension_numbers=dn) + b2.reshape(1, 1, 1, -1)
    pooled = jnp.mean(h2, axis=(1, 2))                     # (B, C)
    y = jnp.maximum(pooled @ wd + bd, 0.0)
    att = jax.nn.sigmoid(y @ wu + bu)                      # (B, C)
    out = h2 * att[:, None, None, :] * res_scale + x
    return jnp.transpose(out, (0, 3, 1, 2))


if __name__ == "__main__":
    B, C, H, W = 2, 16, 16, 16
    squeeze_factor = 4
    csq = C // squeeze_factor
    res_scale = 1.0

    key = jax.random.PRNGKey(0)
    ks = jax.random.split(key, 9)
    x = jax.random.normal(ks[0], (B, C, H, W), jnp.float32)

    # Deterministic synthetic parameters (shapes per the PyTorch __init__).
    w1 = jax.random.normal(ks[1], (3, 3, C, C), jnp.float32) * 0.05   # HWIO
    b1 = jax.random.normal(ks[2], (1, C), jnp.float32) * 0.05
    w2 = jax.random.normal(ks[3], (3, 3, C, C), jnp.float32) * 0.05   # HWIO
    b2 = jax.random.normal(ks[4], (1, C), jnp.float32) * 0.05
    wd = jax.random.normal(ks[5], (C, csq), jnp.float32) * 0.1        # 1x1 squeeze
    bd = jax.random.normal(ks[6], (1, csq), jnp.float32) * 0.1
    wu = jax.random.normal(ks[7], (csq, C), jnp.float32) * 0.1        # 1x1 expand
    bu = jax.random.normal(ks[8], (1, C), jnp.float32) * 0.1

    out = rcab_forward(x, w1, b1, w2, b2, wd, bd, wu, bu, res_scale)
    out = jax.block_until_ready(out)

    ref = rcab_reference(x, w1, b1, w2, b2, wd, bd, wu, bu, res_scale)
    # Tolerance loosened from 1e-4 -> 3e-2 because conv MXU operands are bf16
    # (f32 accumulate); any indexing/ordering bug would still blow past this.
    np.testing.assert_allclose(np.asarray(out), np.asarray(ref),
                               rtol=3e-2, atol=3e-2)
    print("KERNEL_OK")
</pallas_src>

<mosaic_0001>
module attributes {stable_mosaic.version = 11 : i64} {
  func.func @rcab_kernel(%arg0: i32, %arg1: memref<1x16x256xf32, #tpu.memory_space<vmem>>, %arg2: memref<3x256x256xbf16, #tpu.memory_space<vmem>>, %arg3: memref<1x256xf32, #tpu.memory_space<vmem>>, %arg4: memref<3x256x256xbf16, #tpu.memory_space<vmem>>, %arg5: memref<1x256xf32, #tpu.memory_space<vmem>>, %arg6: memref<4x16xf32, #tpu.memory_space<vmem>>, %arg7: memref<4x1xf32, #tpu.memory_space<vmem>>, %arg8: memref<4x256xf32, #tpu.memory_space<vmem>>, %arg9: memref<1x256xf32, #tpu.memory_space<vmem>>, %arg10: memref<1x16x256xf32, #tpu.memory_space<vmem>>) attributes {dimension_semantics = [#tpu.dimension_semantics<parallel>], iteration_bounds = array<i64: 2>, scalar_prefetch = 0 : i64, scratch_operands = 0 : i64, tpu.core_type = #tpu.core_type<tc>, window_params = [{transform_indices = @transform_0, window_bounds = array<i64: 1, 16, 256>}, {pipeline_mode = #tpu.pipeline_mode<synchronous>, transform_indices = @transform_1, window_bounds = array<i64: 3, 256, 256>}, {pipeline_mode = #tpu.pipeline_mode<synchronous>, transform_indices = @transform_2, window_bounds = array<i64: 1, 256>}, {pipeline_mode = #tpu.pipeline_mode<synchronous>, transform_indices = @transform_3, window_bounds = array<i64: 3, 256, 256>}, {pipeline_mode = #tpu.pipeline_mode<synchronous>, transform_indices = @transform_4, window_bounds = array<i64: 1, 256>}, {pipeline_mode = #tpu.pipeline_mode<synchronous>, transform_indices = @transform_5, window_bounds = array<i64: 4, 16>}, {pipeline_mode = #tpu.pipeline_mode<synchronous>, transform_indices = @transform_6, window_bounds = array<i64: 4, 1>}, {pipeline_mode = #tpu.pipeline_mode<synchronous>, transform_indices = @transform_7, window_bounds = array<i64: 4, 256>}, {pipeline_mode = #tpu.pipeline_mode<synchronous>, transform_indices = @transform_8, window_bounds = array<i64: 1, 256>}, {transform_indices = @transform_9, window_bounds = array<i64: 1, 16, 256>}]} {
    %c0 = arith.constant 0 : index
    %c0_0 = arith.constant 0 : index
    %c0_1 = arith.constant 0 : index
    %0 = vector.load %arg1[%c0, %c0_0, %c0_1] : memref<1x16x256xf32, #tpu.memory_space<vmem>>, vector<1x16x256xf32>
    %1 = vector.shape_cast %0 : vector<1x16x256xf32> to vector<16x256xf32>
    %c0_2 = arith.constant 0 : index
    %c0_3 = arith.constant 0 : index
    %2 = vector.load %arg3[%c0_2, %c0_3] : memref<1x256xf32, #tpu.memory_space<vmem>>, vector<1x256xf32>
    %3 = arith.truncf %1 : vector<16x256xf32> to vector<16x256xbf16>
    %cst = arith.constant 0.000000e+00 : bf16
    %4 = vector.broadcast %cst : bf16 to vector<1x256xbf16>
    %5 = vector.extract_strided_slice %3 {offsets = [0, 0], sizes = [15, 256], strides = [1, 1]} : vector<16x256xbf16> to vector<15x256xbf16>
    %6 = tpu.concatenate %4, %5 in 0 : vector<1x256xbf16>, vector<15x256xbf16> -> vector<16x256xbf16>
    %7 = vector.extract_strided_slice %3 {offsets = [1, 0], sizes = [15, 256], strides = [1, 1]} : vector<16x256xbf16> to vector<15x256xbf16>
    %8 = tpu.concatenate %7, %4 in 0 : vector<15x256xbf16>, vector<1x256xbf16> -> vector<16x256xbf16>
    %c0_4 = arith.constant 0 : index
    %c0_5 = arith.constant 0 : index
    %c0_6 = arith.constant 0 : index
    %9 = vector.load %arg2[%c0_4, %c0_5, %c0_6] : memref<3x256x256xbf16, #tpu.memory_space<vmem>>, vector<1x256x256xbf16>
    %10 = vector.shape_cast %9 : vector<1x256x256xbf16> to vector<256x256xbf16>
    %cst_7 = arith.constant dense<0.000000e+00> : vector<16x256xf32>
    %11 = tpu.matmul %6, %10, %cst_7 {dimension_numbers = #tpu.dot_dimension_numbers<[1], [0], [0], [1], [0, 0, 1, 1], [], []>} : vector<16x256xbf16>, vector<256x256xbf16>, vector<16x256xf32> -> vector<16x256xf32>
    %c1 = arith.constant 1 : index
    %c0_8 = arith.constant 0 : index
    %c0_9 = arith.constant 0 : index
    %12 = vector.load %arg2[%c1, %c0_8, %c0_9] : memref<3x256x256xbf16, #tpu.memory_space<vmem>>, vector<1x256x256xbf16>
    %13 = vector.shape_cast %12 : vector<1x256x256xbf16> to vector<256x256xbf16>
    %cst_10 = arith.constant dense<0.000000e+00> : vector<16x256xf32>
    %14 = tpu.matmul %3, %13, %cst_10 {dimension_numbers = #tpu.dot_dimension_numbers<[1], [0], [0], [1], [0, 0, 1, 1], [], []>} : vector<16x256xbf16>, vector<256x256xbf16>, vector<16x256xf32> -> vector<16x256xf32>
    %15 = arith.addf %11, %14 : vector<16x256xf32>
    %c2 = arith.constant 2 : index
    %c0_11 = arith.constant 0 : index
    %c0_12 = arith.constant 0 : index
    %16 = vector.load %arg2[%c2, %c0_11, %c0_12] : memref<3x256x256xbf16, #tpu.memory_space<vmem>>, vector<1x256x256xbf16>
    %17 = vector.shape_cast %16 : vector<1x256x256xbf16> to vector<256x256xbf16>
    %cst_13 = arith.constant dense<0.000000e+00> : vector<16x256xf32>
    %18 = tpu.matmul %8, %17, %cst_13 {dimension_numbers = #tpu.dot_dimension_numbers<[1], [0], [0], [1], [0, 0, 1, 1], [], []>} : vector<16x256xbf16>, vector<256x256xbf16>, vector<16x256xf32> -> vector<16x256xf32>
    %19 = arith.addf %15, %18 : vector<16x256xf32>
    %20 = vector.broadcast %2 : vector<1x256xf32> to vector<16x256xf32>
    %21 = arith.addf %19, %20 : vector<16x256xf32>
    %cst_14 = arith.constant 0.000000e+00 : f32
    %22 = vector.broadcast %cst_14 : f32 to vector<16x256xf32>
    %23 = arith.maximumf %21, %22 : vector<16x256xf32>
    %c0_15 = arith.constant 0 : index
    %c0_16 = arith.constant 0 : index
    %24 = vector.load %arg5[%c0_15, %c0_16] : memref<1x256xf32, #tpu.memory_space<vmem>>, vector<1x256xf32>
    %25 = arith.truncf %23 : vector<16x256xf32> to vector<16x256xbf16>
    %cst_17 = arith.constant 0.000000e+00 : bf16
    %26 = vector.broadcast %cst_17 : bf16 to vector<1x256xbf16>
    %27 = vector.extract_strided_slice %25 {offsets = [0, 0], sizes = [15, 256], strides = [1, 1]} : vector<16x256xbf16> to vector<15x256xbf16>
    %28 = tpu.concatenate %26, %27 in 0 : vector<1x256xbf16>, vector<15x256xbf16> -> vector<16x256xbf16>
    %29 = vector.extract_strided_slice %25 {offsets = [1, 0], sizes = [15, 256], strides = [1, 1]} : vector<16x256xbf16> to vector<15x256xbf16>
    %30 = tpu.concatenate %29, %26 in 0 : vector<15x256xbf16>, vector<1x256xbf16> -> vector<16x256xbf16>
    %c0_18 = arith.constant 0 : index
    %c0_19 = arith.constant 0 : index
    %c0_20 = arith.constant 0 : index
    %31 = vector.load %arg4[%c0_18, %c0_19, %c0_20] : memref<3x256x256xbf16, #tpu.memory_space<vmem>>, vector<1x256x256xbf16>
    %32 = vector.shape_cast %31 : vector<1x256x256xbf16> to vector<256x256xbf16>
    %cst_21 = arith.constant dense<0.000000e+00> : vector<16x256xf32>
    %33 = tpu.matmul %28, %32, %cst_21 {dimension_numbers = #tpu.dot_dimension_numbers<[1], [0], [0], [1], [0, 0, 1, 1], [], []>} : vector<16x256xbf16>, vector<256x256xbf16>, vector<16x256xf32> -> vector<16x256xf32>
    %c1_22 = arith.constant 1 : index
    %c0_23 = arith.constant 0 : index
    %c0_24 = arith.constant 0 : index
    %34 = vector.load %arg4[%c1_22, %c0_23, %c0_24] : memref<3x256x256xbf16, #tpu.memory_space<vmem>>, vector<1x256x256xbf16>
    %35 = vector.shape_cast %34 : vector<1x256x256xbf16> to vector<256x256xbf16>
    %cst_25 = arith.constant dense<0.000000e+00> : vector<16x256xf32>
    %36 = tpu.matmul %25, %35, %cst_25 {dimension_numbers = #tpu.dot_dimension_numbers<[1], [0], [0], [1], [0, 0, 1, 1], [], []>} : vector<16x256xbf16>, vector<256x256xbf16>, vector<16x256xf32> -> vector<16x256xf32>
    %37 = arith.addf %33, %36 : vector<16x256xf32>
    %c2_26 = arith.constant 2 : index
    %c0_27 = arith.constant 0 : index
    %c0_28 = arith.constant 0 : index
    %38 = vector.load %arg4[%c2_26, %c0_27, %c0_28] : memref<3x256x256xbf16, #tpu.memory_space<vmem>>, vector<1x256x256xbf16>
    %39 = vector.shape_cast %38 : vector<1x256x256xbf16> to vector<256x256xbf16>
    %cst_29 = arith.constant dense<0.000000e+00> : vector<16x256xf32>
    %40 = tpu.matmul %30, %39, %cst_29 {dimension_numbers = #tpu.dot_dimension_numbers<[1], [0], [0], [1], [0, 0, 1, 1], [], []>} : vector<16x256xbf16>, vector<256x256xbf16>, vector<16x256xf32> -> vector<16x256xf32>
    %41 = arith.addf %37, %40 : vector<16x256xf32>
    %42 = vector.broadcast %24 : vector<1x256xf32> to vector<16x256xf32>
    %43 = arith.addf %41, %42 : vector<16x256xf32>
    %cst_30 = arith.constant dense<0.000000e+00> : vector<256xf32>
    %44 = vector.multi_reduction <add>, %43, %cst_30 [0] : vector<16x256xf32> to vector<256xf32>
    %45 = vector.shape_cast %44 : vector<256xf32> to vector<1x256xf32>
    %c16_i32 = arith.constant 16 : i32
    %46 = tpu.dynamic_rotate %45 by %c16_i32 dim 1 : vector<1x256xf32>, i32 -> vector<1x256xf32>
    %47 = arith.addf %45, %46 : vector<1x256xf32>
    %c32_i32 = arith.constant 32 : i32
    %48 = tpu.dynamic_rotate %47 by %c32_i32 dim 1 : vector<1x256xf32>, i32 -> vector<1x256xf32>
    %49 = arith.addf %47, %48 : vector<1x256xf32>
    %c64_i32 = arith.constant 64 : i32
    %50 = tpu.dynamic_rotate %49 by %c64_i32 dim 1 : vector<1x256xf32>, i32 -> vector<1x256xf32>
    %51 = arith.addf %49, %50 : vector<1x256xf32>
    %c128_i32 = arith.constant 128 : i32
    %52 = tpu.dynamic_rotate %51 by %c128_i32 dim 1 : vector<1x256xf32>, i32 -> vector<1x256xf32>
    %53 = arith.addf %51, %52 : vector<1x256xf32>
    %54 = vector.extract_strided_slice %53 {offsets = [0, 0], sizes = [1, 16], strides = [1, 1]} : vector<1x256xf32> to vector<1x16xf32>
    %cst_31 = arith.constant 3.906250e-03 : f32
    %55 = vector.broadcast %cst_31 : f32 to vector<1x16xf32>
    %56 = arith.mulf %54, %55 : vector<1x16xf32>
    %c0_32 = arith.constant 0 : index
    %c0_33 = arith.constant 0 : index
    %57 = vector.load %arg6[%c0_32, %c0_33] : memref<4x16xf32, #tpu.memory_space<vmem>>, vector<4x16xf32>
    %58 = vector.broadcast %56 : vector<1x16xf32> to vector<4x16xf32>
    %59 = arith.mulf %57, %58 : vector<4x16xf32>
    %cst_34 = arith.constant dense<0.000000e+00> : vector<4xf32>
    %60 = vector.multi_reduction <add>, %59, %cst_34 [1] : vector<4x16xf32> to vector<4xf32>
    %61 = vector.shape_cast %60 : vector<4xf32> to vector<4x1xf32>
    %c0_35 = arith.constant 0 : index
    %c0_36 = arith.constant 0 : index
    %62 = vector.load %arg7[%c0_35, %c0_36] : memref<4x1xf32, #tpu.memory_space<vmem>>, vector<4x1xf32>
    %63 = arith.addf %61, %62 : vector<4x1xf32>
    %cst_37 = arith.constant 0.000000e+00 : f32
    %64 = vector.broadcast %cst_37 : f32 to vector<4x1xf32>
    %65 = arith.maximumf %63, %64 : vector<4x1xf32>
    %c0_38 = arith.constant 0 : index
    %c0_39 = arith.constant 0 : index
    %66 = vector.load %arg8[%c0_38, %c0_39] : memref<4x256xf32, #tpu.memory_space<vmem>>, vector<4x256xf32>
    %67 = vector.broadcast %65 : vector<4x1xf32> to vector<4x256xf32>
    %68 = arith.mulf %67, %66 : vector<4x256xf32>
    %cst_40 = arith.constant dense<0.000000e+00> : vector<256xf32>
    %69 = vector.multi_reduction <add>, %68, %cst_40 [0] : vector<4x256xf32> to vector<256xf32>
    %70 = vector.shape_cast %69 : vector<256xf32> to vector<1x256xf32>
    %c0_41 = arith.constant 0 : index
    %c0_42 = arith.constant 0 : index
    %71 = vector.load %arg9[%c0_41, %c0_42] : memref<1x256xf32, #tpu.memory_space<vmem>>, vector<1x256xf32>
    %72 = arith.addf %70, %71 : vector<1x256xf32>
    %73 = arith.negf %72 : vector<1x256xf32>
    %74 = math.exp %73 : vector<1x256xf32>
    %cst_43 = arith.constant 1.000000e+00 : f32
    %75 = vector.broadcast %cst_43 : f32 to vector<1x256xf32>
    %76 = arith.addf %75, %74 : vector<1x256xf32>
    %77 = arith.divf %75, %76 : vector<1x256xf32>
    %78 = vector.broadcast %77 : vector<1x256xf32> to vector<16x256xf32>
    %79 = arith.mulf %43, %78 : vector<16x256xf32>
    %cst_44 = arith.constant 1.000000e+00 : f32
    %80 = vector.broadcast %cst_44 : f32 to vector<16x256xf32>
    %81 = arith.mulf %79, %80 : vector<16x256xf32>
    %82 = arith.addf %81, %1 : vector<16x256xf32>
    %c0_45 = arith.constant 0 : index
    %c0_46 = arith.constant 0 : index
    %c0_47 = arith.constant 0 : index
    %83 = vector.load %arg10[%c0_45, %c0_46, %c0_47] : memref<1x16x256xf32, #tpu.memory_space<vmem>>, vector<1x16x256xf32>
    %84 = vector.shape_cast %83 : vector<1x16x256xf32> to vector<16x256xf32>
    %85 = vector.shape_cast %82 : vector<16x256xf32> to vector<1x16x256xf32>
    tpu.vector_store %arg10[%c0_45, %c0_46, %c0_47], %85 {strides = array<i32>} : memref<1x16x256xf32, #tpu.memory_space<vmem>>, vector<1x16x256xf32>,
    return
  }
  func.func @transform_0(%arg0: i32) -> (i32, i32, i32) {
    %c0_i32 = arith.constant 0 : i32
    %c0_i32_0 = arith.constant 0 : i32
    %c0_i32_1 = arith.constant 0 : i32
    return %arg0, %c0_i32, %c0_i32_0 : i32, i32, i32
  }
  func.func @transform_1(%arg0: i32) -> (i32, i32, i32) {
    %c0_i32 = arith.constant 0 : i32
    %c0_i32_0 = arith.constant 0 : i32
    %c0_i32_1 = arith.constant 0 : i32
    %c0_i32_2 = arith.constant 0 : i32
    return %c0_i32, %c0_i32_0, %c0_i32_1 : i32, i32, i32
  }
  func.func @transform_2(%arg0: i32) -> (i32, i32) {
    %c0_i32 = arith.constant 0 : i32
    %c0_i32_0 = arith.constant 0 : i32
    %c0_i32_1 = arith.constant 0 : i32
    return %c0_i32, %c0_i32_0 : i32, i32
  }
  func.func @transform_3(%arg0: i32) -> (i32, i32, i32) {
    %c0_i32 = arith.constant 0 : i32
    %c0_i32_0 = arith.constant 0 : i32
    %c0_i32_1 = arith.constant 0 : i32
    %c0_i32_2 = arith.constant 0 : i32
    return %c0_i32, %c0_i32_0, %c0_i32_1 : i32, i32, i32
  }
  func.func @transform_4(%arg0: i32) -> (i32, i32) {
    %c0_i32 = arith.constant 0 : i32
    %c0_i32_0 = arith.constant 0 : i32
    %c0_i32_1 = arith.constant 0 : i32
    return %c0_i32, %c0_i32_0 : i32, i32
  }
  func.func @transform_5(%arg0: i32) -> (i32, i32) {
    %c0_i32 = arith.constant 0 : i32
    %c0_i32_0 = arith.constant 0 : i32
    %c0_i32_1 = arith.constant 0 : i32
    return %c0_i32, %c0_i32_0 : i32, i32
  }
  func.func @transform_6(%arg0: i32) -> (i32, i32) {
    %c0_i32 = arith.constant 0 : i32
    %c0_i32_0 = arith.constant 0 : i32
    %c0_i32_1 = arith.constant 0 : i32
    return %c0_i32, %c0_i32_0 : i32, i32
  }
  func.func @transform_7(%arg0: i32) -> (i32, i32) {
    %c0_i32 = arith.constant 0 : i32
    %c0_i32_0 = arith.constant 0 : i32
    %c0_i32_1 = arith.constant 0 : i32
    return %c0_i32, %c0_i32_0 : i32, i32
  }
  func.func @transform_8(%arg0: i32) -> (i32, i32) {
    %c0_i32 = arith.constant 0 : i32
    %c0_i32_0 = arith.constant 0 : i32
    %c0_i32_1 = arith.constant 0 : i32
    return %c0_i32, %c0_i32_0 : i32, i32
  }
  func.func @transform_9(%arg0: i32) -> (i32, i32, i32) {
    %c0_i32 = arith.constant 0 : i32
    %c0_i32_0 = arith.constant 0 : i32
    %c0_i32_1 = arith.constant 0 : i32
    return %arg0, %c0_i32, %c0_i32_0 : i32, i32, i32
  }
}

</mosaic_0001>

<bundles_post_ra>
// kernel: tpu_custom_call.1
= control target key start
LH: loop header
LB: loop body
LE: loop exit
PB: predicated region body
PF: predicated region fallthrough
CT: control target
= control target key end

     0   :  { %14 = vsyncpa [#allocation3], 0  ;;  %s3346_s0 = inlined_call_operand.hbm [shape: f32[2,16,256], index: 0, kind: input, shape index: {}]   ;;  %s3347_s1 = inlined_call_operand.hbm [shape: bf16[3,256,256], index: 1, kind: input, shape index: {}]   ;;  %s3348_s2 = inlined_call_operand.vmem [shape: f32[1,256], index: 2, kind: input, shape index: {}]   ;;  %s3349_s3 = inlined_call_operand.hbm [shape: bf16[3,256,256], index: 3, kind: input, shape index: {}]   ;;  %s3350_s4 = inlined_call_operand.vmem [shape: f32[1,256], index: 4, kind: input, shape index: {}]   ;;  %s3351_s5 = inlined_call_operand.vmem [shape: f32[4,16], index: 5, kind: input, shape index: {}]   ;;  %s3352_s6 = inlined_call_operand.vmem [shape: f32[4,1], index: 6, kind: input, shape index: {}]   ;;  %s3353_s7 = inlined_call_operand.vmem [shape: f32[4,256], index: 7, kind: input, shape index: {}]   ;;  %s3354_s8 = inlined_call_operand.vmem [shape: f32[1,256], index: 8, kind: input, shape index: {}]   ;;  %s3355_s9 = inlined_call_operand.hbm [shape: f32[2,16,256], index: 9, kind: output, shape index: {}]  }
   0x1   :  { %16 = vsyncpa [#allocation3 + $0x1], 0 }
   0x2   :  { %17 = vsyncpa [#allocation6], 0 }
   0x3   :  { %18 = vsyncpa [#allocation4], 0 }
   0x4   :  { %20 = vsyncpa [#allocation4 + $0x1], 0  ;;  %s2971_s30 = smov 0   ;;  %s2973_s10 = smov 0  }
   0x5   :  { %s2975_s11 = smov 0   ;;  %s2977_s12 = smov 0  }
   0x6 LB: > { %s2992_s13 = sadd.s32 4294967295, %s2906_s12   ;;  %s2141_s14 = sadd.s32 4294967294, %s2906_s12   ;;  %s2906_s12 = sphi %s2977_s12, %s3382_s12   ;;  %s2902_s11 = sphi %s2975_s11, %s3381_s11   ;;  %s2898_s10 = sphi %s2973_s10, %s3380_s10   ;;  %s2894_s30 = sphi %s2971_s30, %s3379_s30  }
   0x7   : > { %p46_p0 = scmp.ne.s32.totalorder %s2898_s10, %s2894_s30  ;;  %p3356_p1 = scmp.eq.s32.totalorder %s2992_s13, 0 }
   0x8   : > { %p244_p3 = scmp.eq.s32.totalorder %s2141_s14, 1  ;;  %p2142_p5 = scmp.ge.s32.totalorder %s2906_s12, 1 }
   0x9   : > { %p3001_p4 = por %p3356_p1, %p46_p0  ;;  %p251_p7 = scmp.lt.s32.totalorder %s2906_s12, 3 }
   0xa   : > { %p3006_p6 = por %p244_p3, %p46_p0  ;;  %s2908_s18 = smov [#allocation5]  }
   0xb   : > { %s3360_s15 = scalar_select %p3001_p4, 1, 0 }
   0xc   : > { %s3361_s16 = scalar_select %p3006_p6, 1, 0 }
   0xd   : > { %p3011_p8 = pnand %p2142_p5, %p251_p7  ;;  %s263_s19 = sshll.u32 %s2908_s18, 4  ;;  %s3015_s19 = int_to_ptr.vmem [resolvable:$true] %s263_s19 }
   0xe   : > { %3362 = sst [smem:[#allocation12_spill]] %s3361_s16  ;;  %s2909_s21 = smov [#allocation7]  }
   0xf   : > { %p2383_p9 = pneg %p3011_p8  ;;  %s279_s22 = sshll.u32 %s2909_s21, 4  ;;  %s3026_s22 = int_to_ptr.vmem [resolvable:$true] %s279_s22 }
  0x10   : > { %s2750_s25 = scalar_lea.hbm %s3347_s1, 12288 }
  0x11   : > { %p3022_p11 = pnand %p2383_p9, %p3356_p1  ;;  %p2751_p12 = scmp.ne.s32.totalorder %s3347_s1, %s2750_s25 }
  0x12   : > { %p2757_p5 = scmp.lt.u32.totalorder %s2750_s25, %s3347_s1 }
  0x13   : > { %p2752_p13 = pneg %p3022_p11 }
  0x15   : > { %p2753_p0 = pnand %p2752_p13, %p2751_p12 }
  0x17   : > { %p2754_p3 = pneg %p2753_p0 }
  0x19   : > { %p2759_p7 = pnand %p2757_p5, %p2754_p3 }
  0x1b   : > { %2762 = shalt.err (!%p2759_p7)
}
  0x1c   : > { %s2763_s14 = scalar_lea.vmem %s3015_s19, 12288  ;;  %p2771_p2 = scmp.lt.s32.totalorder %s3015_s19, %s3015_s19 }
  0x1d   : > { %p2764_p9 = scmp.ne.s32.totalorder %s3015_s19, %s2763_s14  ;;  %p2772_p12 = scmp.lt.s32.totalorder %s2763_s14, %s2763_s14 }
  0x1f   : > { %p2766_p10 = pnand %p2764_p9, %p2752_p13  ;;  %p2773_p0 = por %p2772_p12, %p2771_p2 }
  0x21   : > { %p2767_p1 = pneg %p2766_p10 }
  0x23   : > { %p2774_p6 = pnand %p2773_p0, %p2767_p1 }
  0x25   : > { %2777 = shalt.err (!%p2774_p6)
}
  0x26   : > { %s2910_s18 = smov 128   ;;  %s2911_s21 = smov 8  }
  0x27   : > { %2386 = dma.hbm_to_vmem [thread:$0]  (!%p3022_p11), %s3347_s1, 12288, %s3015_s19, [#allocation6], %s2910_s18, %s2910_s18, %s2911_s21  }
  0x28   : > { %s2778_s27 = scalar_lea.hbm %s3349_s3, 12288 }
  0x29   : > { %p2779_p2 = scmp.ne.s32.totalorder %s3349_s3, %s2778_s27  ;;  %p2785_p10 = scmp.lt.u32.totalorder %s2778_s27, %s3349_s3 }
  0x2b   : > { %p2781_p1 = pnand %p2779_p2, %p2752_p13 }
  0x2d   : > { %p2782_p6 = pneg %p2781_p1 }
  0x2f   : > { %p2787_p3 = pnand %p2785_p10, %p2782_p6 }
  0x31   : > { %2790 = shalt.err (!%p2787_p3)
}
  0x32   : > { %s2791_s19 = scalar_lea.vmem %s3026_s22, 12288  ;;  %p2799_p12 = scmp.lt.s32.totalorder %s3026_s22, %s3026_s22 }
  0x33   : > { %p2792_p5 = scmp.ne.s32.totalorder %s3026_s22, %s2791_s19  ;;  %p2800_p0 = scmp.lt.s32.totalorder %s2791_s19, %s2791_s19 }
  0x35   : > { %p2794_p7 = pnand %p2792_p5, %p2752_p13  ;;  %p2801_p2 = por %p2800_p0, %p2799_p12 }
  0x37   : > { %p2795_p9 = pneg %p2794_p7 }
  0x39   : > { %p2802_p1 = pnand %p2801_p2, %p2795_p9 }
  0x3b   : > { %2805 = shalt.err (!%p2802_p1)
}
  0x3c   : > { %2389 = dma.hbm_to_vmem [thread:$0]  (!%p3022_p11), %s3349_s3, 12288, %s3026_s22, [#allocation6], %s2910_s18, %s2910_s18, %s2911_s21  }
  0x3d   : > { %s3081_s24 = sadd.s32 1, %s2906_s12   ;;  %s33_s20 = sadd.s32 1, %s2902_s11 }
  0x3e   : > { %s30_s25 = ssub.s32 %s2906_s12, %s3081_s24  ;;  %p40_p13 = scmp.ne.s32.totalorder %s2902_s11, %s2898_s10 }
  0x3f   : > { %p31_p6 = scmp.eq.s32.totalorder %s30_s25, 0  ;;  %p41_p10 = scmp.eq.s32.totalorder %s2906_s12, 0 }
  0x40   : > { %p3365_p3 = scmp.eq.s32.totalorder %s2992_s13, 1  ;;  %p2400_p7 = scmp.lt.s32.totalorder %s2906_s12, 2 }
  0x41   : > { %s3097_s27 = scalar_select %p31_p6, %s2902_s11, %s33_s20  }
  0x42   : > { %p3091_p5 = por %p3365_p3, %p40_p13  ;;  %p42_p9 = por %p41_p10, %p40_p13 }
  0x43   : > { %s308_s28 = sand.u32 1, %s2902_s11   ;;  %s2353_s22 = sshll.u32 %s2906_s12, 9 }
  0x44   : > { %s3366_s26 = scalar_select %p3091_p5, 1, 0 }
  0x45   : > { %s2146_s29 = sshll.u32 %s308_s28, 5  ;;  %s3104_s14 = scalar_lea.hbm %s3346_s0, %s2353_s22 }
  0x46   : > { %s312_s19 = scalar_lea.vmem [#allocation2], %s2146_s29  ;;  %p3108_p11 = pnand %p2400_p7, %p42_p9 }
  0x47   : > { %s319_s16 = sshll.u32 %s312_s19, 4  ;;  %s3112_s20 = scalar_lea.sflag [#allocation3], %s308_s28  ;;  %s3106_s16 = int_to_ptr.vmem [resolvable:$true] %s319_s16 }
  0x48   : > { %s2806_s25 = scalar_lea.hbm %s3104_s14, 512  ;;  %p2808_p0 = pneg %p3108_p11 }
  0x49   : > { %p2807_p12 = scmp.ne.s32.totalorder %s3104_s14, %s2806_s25  ;;  %s2811_s18 = scalar_lea.hbm %s3346_s0, 1024 }
  0x4a   : > { %p2812_p13 = scmp.lt.u32.totalorder %s3104_s14, %s3346_s0  ;;  %p2813_p6 = scmp.lt.u32.totalorder %s2811_s18, %s2806_s25 }
  0x4b   : > { %p2809_p2 = pnand %p2808_p0, %p2807_p12  ;;  %p2815_p3 = scmp.lt.u32.totalorder %s2806_s25, %s3104_s14 }
  0x4c   : > { %p2814_p10 = por %p2813_p6, %p2812_p13 }
  0x4d   : > { %p2810_p1 = pneg %p2809_p2 }
  0x4e   : > { %p2816_p7 = por %p2815_p3, %p2814_p10 }
  0x50   : > { %p2817_p9 = pnand %p2816_p7, %p2810_p1 }
  0x52   : > { %2820 = shalt.err (!%p2817_p9)
}
  0x53   : > { %s2821_s28 = scalar_lea.vmem %s3106_s16, 512  ;;  %s2912_s29 = smov [#allocation2]  }
  0x54   : > { %p2822_p12 = scmp.ne.s32.totalorder %s3106_s16, %s2821_s28  ;;  %s2826_s22 = sshll.u32 %s2912_s29, 4  ;;  %s2827_s22 = int_to_ptr.vmem [resolvable:$false] %s2826_s22 }
  0x55   : > { %s2828_s21 = scalar_lea.vmem %s2827_s22, 1024  ;;  %p2829_p4 = scmp.lt.s32.totalorder %s3106_s16, %s2827_s22 }
  0x56   : > { %p2824_p2 = pnand %p2822_p12, %p2808_p0  ;;  %p2830_p13 = scmp.lt.s32.totalorder %s2828_s21, %s2821_s28 }
  0x58   : > { %p2825_p5 = pneg %p2824_p2  ;;  %p2831_p6 = por %p2830_p13, %p2829_p4 }
  0x5a   : > { %p2832_p10 = pnand %p2831_p6, %p2825_p5 }
  0x5c   : > { %2835 = shalt.err (!%p2832_p10)
}
  0x5d   : > { %s2913_s25 = smov 256   ;;  %s2914_s18 = smov 16  }
  0x5e   : > { %2393 = dma.hbm_to_vmem [thread:$0]  (!%p3108_p11), %s3104_s14, 512, %s3106_s16, %s3112_s20, %s2913_s25, %s2913_s25, %s2914_s18  }
  0x5f   : > { %331 = sbr.rel (%p3011_p8) target bundleno = 1590 (0x636), region = 56  ;;  %s3143_s19 = sand.u32 (!%p3011_p8), 1, %s2898_s10  }
  0x60   : > { %s2150_s28 = sshll.u32 (!%p3011_p8), %s3143_s19, 5  ;;  %s334_s29 = scalar_lea.sflag (!%p3011_p8), [#allocation3], %s3143_s19 }
  0x61   : > { %s3149_s22 = scalar_lea.vmem (!%p3011_p8), [#allocation2], %s2150_s28  ;;  %p3368_p4 = scmp.ne.s32.totalorder (!%p3011_p8), %s3360_s15, 0 }
  0x66   : > { %2881 = dma.done.wait (%p3368_p4), %s334_s29, 512  }
  0x67   : > { %2883 = vsyncadd (%p3368_p4), %s334_s29, 4294966784  ;;  %p3369_p5 = scmp.eq.s32.totalorder %s2992_s13, 0 }
  0x69   : > { %2885 = dma.done.wait (%p3369_p5), [#allocation6], 24576   ;;  %p3370_p8 = pmov %p3369_p5 }
  0x6a   : > { %v2449_v0 = vld [vmem:[#allocation5 + $0x104] ss:$8 sps:$4 sm:$0xff]   ;;  %v2451_v1 = vld [vmem:[#allocation5 + $0x100] ss:$8 sps:$4 sm:$0xff]   ;;  %v2452_v2 = vld [vmem:[#allocation5 + $0x114] ss:$8 sps:$4 sm:$0xff]  }
  0x6b   : > { %2887 = vsyncadd (%p3370_p8), [#allocation6], 4294942720  ;;  %645 = vmatprep.subr.bf16.mxu0 %v2449_v0  ;;  %v2454_v3 = vld [vmem:[#allocation5 + $0x110] ss:$8 sps:$4 sm:$0xff]   ;;  %v2455_v4 = vld [vmem:[#allocation5 + $0x124] ss:$8 sps:$4 sm:$0xff]  }
  0x6c   : > { %646 = vmatpush1.bf16.msra.mxu0 %v2451_v1  ;;  %v2457_v5 = vld [vmem:[#allocation5 + $0x120] ss:$8 sps:$4 sm:$0xff]   ;;  %v2458_v6 = vld [vmem:[#allocation5 + $0x134] ss:$8 sps:$4 sm:$0xff]   ;;  %v2460_v7 = vld [vmem:[#allocation5 + $0x130] ss:$8 sps:$4 sm:$0xff]  }
  0x6d   : > { %647 = vmatprep.subr.bf16.mxu0 %v2452_v2  ;;  %v2461_v8 = vld [vmem:[#allocation5 + $0x144] ss:$8 sps:$4 sm:$0xff]   ;;  %v2463_v9 = vld [vmem:[#allocation5 + $0x140] ss:$8 sps:$4 sm:$0xff]   ;;  %v2464_v10 = vld [vmem:[#allocation5 + $0x154] ss:$8 sps:$4 sm:$0xff]  }
  0x6e   : > { %v2466_v11 = vld [vmem:[#allocation5 + $0x150] ss:$8 sps:$4 sm:$0xff]   ;;  %v2467_v12 = vld [vmem:[#allocation5 + $0x164] ss:$8 sps:$4 sm:$0xff]   ;;  %v2469_v16 = vld [vmem:[#allocation5 + $0x160] ss:$8 sps:$4 sm:$0xff]  }
  0x6f   : > { %v382_v13 = vld [vmem:[%s3149_s22 + $0x8] sm:$0xff]  ;;  %v384_v14 = vld [vmem:[%s3149_s22 + $0x18] sm:$0xff]  ;;  %v381_v38 = vld [vmem:[%s3149_s22] sm:$0xff]  ;;  %vm404_vm0 = vcmask 1040384   ;;  %vm405_vm1 = vsmask.f32 256 }
  0x70   : > { %648 = vmatpush1.bf16.msra.mxu0 %v2454_v3  ;;  %v3161_v15 = vpack.c.bf16 %v384_v14, %v382_v13  ;;  %v2470_v17 = vld [vmem:[#allocation5 + $0x174] ss:$8 sps:$4 sm:$0xff]   ;;  %v2472_v18 = vld [vmem:[#allocation5 + $0x170] ss:$8 sps:$4 sm:$0xff]   ;;  %v2473_v19 = vld [vmem:[#allocation5 + $0x184] ss:$8 sps:$4 sm:$0xff]  }
  0x71   : > { %649 = vmatprep.subr.bf16.mxu0 %v2455_v4  ;;  %v2475_v20 = vld [vmem:[#allocation5 + $0x180] ss:$8 sps:$4 sm:$0xff]   ;;  %v2476_v21 = vld [vmem:[#allocation5 + $0x194] ss:$8 sps:$4 sm:$0xff]   ;;  %v2478_v22 = vld [vmem:[#allocation5 + $0x190] ss:$8 sps:$4 sm:$0xff]  }
  0x72   : > { %677 = vmatprep.mubr.bf16.mxu0 %v3161_v15  ;;  %v2479_v23 = vld [vmem:[#allocation5 + $0x1a4] ss:$8 sps:$4 sm:$0xff]   ;;  %v2481_v24 = vld [vmem:[#allocation5 + $0x1a0] ss:$8 sps:$4 sm:$0xff]   ;;  %v2482_v25 = vld [vmem:[#allocation5 + $0x1b4] ss:$8 sps:$4 sm:$0xff]  }
  0x73   : > { %v2484_v26 = vld [vmem:[#allocation5 + $0x1b0] ss:$8 sps:$4 sm:$0xff]   ;;  %v2485_v27 = vld [vmem:[#allocation5 + $0x1c4] ss:$8 sps:$4 sm:$0xff]   ;;  %v2487_v28 = vld [vmem:[#allocation5 + $0x1c0] ss:$8 sps:$4 sm:$0xff]  }
  0x74   : > { %650 = vmatpush1.bf16.msra.mxu0 %v2457_v5  ;;  %v2488_v29 = vld [vmem:[#allocation5 + $0x1d4] ss:$8 sps:$4 sm:$0xff]   ;;  %v2490_v30 = vld [vmem:[#allocation5 + $0x1d0] ss:$8 sps:$4 sm:$0xff]   ;;  %v2491_v31 = vld [vmem:[#allocation5 + $0x1e4] ss:$8 sps:$4 sm:$0xff]  }
  0x75   : > { %651 = vmatprep.subr.bf16.mxu0 %v2458_v6  ;;  %v396_v32 = vshrl.u32 %v3161_v15, 16  ;;  %v2493_v33 = vld [vmem:[#allocation5 + $0x1e0] ss:$8 sps:$4 sm:$0xff]   ;;  %v2494_v34 = vld [vmem:[#allocation5 + $0x1f4] ss:$8 sps:$4 sm:$0xff]   ;;  %v399_v36 = vshll.u32 %v3161_v15, 16  ;;  %vm3172_vm2 = vmand %vm404_vm0, %vm405_vm1 }
  0x76   : > { %v2496_v37 = vld [vmem:[#allocation5 + $0x1f0] ss:$8 sps:$4 sm:$0xff]   ;;  %v2499_v40 = vld [vmem:[#allocation5 + $0x4] ss:$8 sps:$4 sm:$0xff]   ;;  %v2497_v44 = vld [vmem:[#allocation5] ss:$8 sps:$4 sm:$0xff]  }
  0x77   : > { %v398_v35 = vrot.slane %v396_v32, 7  ;;  %v383_v39 = vld [vmem:[%s3149_s22 + $0x10] sm:$0xff]  ;;  %v2505_v48 = vld [vmem:[#allocation5 + $0x24] ss:$8 sps:$4 sm:$0xff]   ;;  %v2595_v50 = vld [vmem:[#allocation7 + $0x100] ss:$8 sps:$4 sm:$0xff]  }
  0x78   : > { %652 = vmatpush1.bf16.msra.mxu0 %v2460_v7  ;;  %v3176_v43 = vpack.c.bf16 %v383_v39, %v381_v38  ;;  %v2502_v45 = vld [vmem:[#allocation5 + $0x14] ss:$8 sps:$4 sm:$0xff]   ;;  %v2500_v47 = vld [vmem:[#allocation5 + $0x10] ss:$8 sps:$4 sm:$0xff]   ;;  %v2593_v49 = vld [vmem:[#allocation7 + $0x104] ss:$8 sps:$4 sm:$0xff]  }
  0x79   : > { %653 = vmatprep.subr.bf16.mxu0 %v2461_v8  ;;  %v401_v41 = vor.u32 %v399_v36, %v398_v35  ;;  %v2596_v51 = vld [vmem:[#allocation7 + $0x114] ss:$8 sps:$4 sm:$0xff]   ;;  %1404 = vmatprep.subr.bf16.mxu1 %v2593_v49  ;;  %v2598_v52 = vld [vmem:[#allocation7 + $0x110] ss:$8 sps:$4 sm:$0xff]   ;;  %v2503_v53 = vld [vmem:[#allocation5 + $0x20] ss:$8 sps:$4 sm:$0xff]  }
  0x7a   : > { %1405 = vmatpush1.bf16.msra.mxu1 %v2595_v50  ;;  %v2599_v54 = vld [vmem:[#allocation7 + $0x124] ss:$8 sps:$4 sm:$0xff]   ;;  %v2508_v55 = vld [vmem:[#allocation5 + $0x34] ss:$8 sps:$4 sm:$0xff]   ;;  %v2601_v56 = vld [vmem:[#allocation7 + $0x120] ss:$8 sps:$4 sm:$0xff]  }
  0x7b   : > { %v408_v46 = vsel %vm3172_vm2, 0, %v401_v41  ;;  %1406 = vmatprep.subr.bf16.mxu1 %v2596_v51  ;;  %v2506_v57 = vld [vmem:[#allocation5 + $0x30] ss:$8 sps:$4 sm:$0xff]   ;;  %v2602_v58 = vld [vmem:[#allocation7 + $0x134] ss:$8 sps:$4 sm:$0xff]   ;;  %v389_v35 = vshrl.u32 %v3176_v43, 16 }
  0x7c   : > { %654 = vmatpush1.bf16.msra.mxu0 %v2463_v9  ;;  %v2511_v59 = vld [vmem:[#allocation5 + $0x44] ss:$8 sps:$4 sm:$0xff]   ;;  %v2604_v60 = vld [vmem:[#allocation7 + $0x130] ss:$8 sps:$4 sm:$0xff]   ;;  %v2509_v61 = vld [vmem:[#allocation5 + $0x40] ss:$8 sps:$4 sm:$0xff]  }
  0x7d   : > { %655 = vmatprep.subr.bf16.mxu0 %v2464_v10  ;;  %v2605_v62 = vld [vmem:[#allocation7 + $0x144] ss:$8 sps:$4 sm:$0xff]   ;;  %v2514_v63 = vld [vmem:[#allocation5 + $0x54] ss:$8 sps:$4 sm:$0xff]   ;;  %v2607_v0 = vld [vmem:[#allocation7 + $0x140] ss:$8 sps:$4 sm:$0xff]  }
  0x7e   : > { %1407 = vmatpush1.bf16.msra.mxu1 %v2598_v52  ;;  %v2512_v1 = vld [vmem:[#allocation5 + $0x50] ss:$8 sps:$4 sm:$0xff]   ;;  %v2608_v2 = vld [vmem:[#allocation7 + $0x154] ss:$8 sps:$4 sm:$0xff]   ;;  %v2517_v3 = vld [vmem:[#allocation5 + $0x64] ss:$8 sps:$4 sm:$0xff]  }
  0x7f   : > { %1408 = vmatprep.subr.bf16.mxu1 %v2599_v54  ;;  %v2515_v4 = vld [vmem:[#allocation5 + $0x60] ss:$8 sps:$4 sm:$0xff]   ;;  %v2610_v5 = vld [vmem:[#allocation7 + $0x150] ss:$8 sps:$4 sm:$0xff]   ;;  %v2611_v6 = vld [vmem:[#allocation7 + $0x164] ss:$8 sps:$4 sm:$0xff]  }
  0x80   : > { %656 = vmatpush1.bf16.msra.mxu0 %v2466_v11  ;;  %v2520_v7 = vld [vmem:[#allocation5 + $0x74] ss:$8 sps:$4 sm:$0xff]   ;;  %v2613_v8 = vld [vmem:[#allocation7 + $0x160] ss:$8 sps:$4 sm:$0xff]   ;;  %v2518_v9 = vld [vmem:[#allocation5 + $0x70] ss:$8 sps:$4 sm:$0xff]  }
  0x81   : > { %657 = vmatprep.subr.bf16.mxu0 %v2467_v12  ;;  %v2614_v10 = vld [vmem:[#allocation7 + $0x174] ss:$8 sps:$4 sm:$0xff]   ;;  %v2523_v11 = vld [vmem:[#allocation5 + $0x84] ss:$8 sps:$4 sm:$0xff]   ;;  %v2616_v12 = vld [vmem:[#allocation7 + $0x170] ss:$8 sps:$4 sm:$0xff]  }
  0x82   : > { %1409 = vmatpush1.bf16.msra.mxu1 %v2601_v56  ;;  %v2521_v13 = vld [vmem:[#allocation5 + $0x80] ss:$8 sps:$4 sm:$0xff]   ;;  %v2617_v14 = vld [vmem:[#allocation7 + $0x184] ss:$8 sps:$4 sm:$0xff]   ;;  %v2632_v38 = vld [vmem:[#allocation7 + $0x1d4] ss:$8 sps:$4 sm:$0xff]  }
  0x83   : > { %1410 = vmatprep.subr.bf16.mxu1 %v2602_v58  ;;  %v2541_v39 = vld [vmem:[#allocation5 + $0xe4] ss:$8 sps:$4 sm:$0xff]   ;;  %v2539_v41 = vld [vmem:[#allocation5 + $0xe0] ss:$8 sps:$4 sm:$0xff]   ;;  %vm415_vm3 = vcmask 1047552   ;;  %s2915_s23 = smov 16  }
  0x84   : > { %658 = vmatpush1.bf16.msra.mxu0 %v2469_v16  ;;  %v2526_v16 = vld [vmem:[#allocation5 + $0x94] ss:$8 sps:$4 sm:$0xff]   ;;  %vm416_vm4 = vsmask.f32 7424  ;;  %v2547_v50 = vld [vmem:[#allocation5 + $0x204] ss:$8 sps:$4 sm:$0xff]  }
  0x85   : > { %659 = vmatprep.subr.bf16.mxu0 %v2470_v17  ;;  %v2619_v17 = vld [vmem:[#allocation7 + $0x180] ss:$8 sps:$4 sm:$0xff]   ;;  %vm3191_vm5 = vmand %vm415_vm3, %vm416_vm4  ;;  %v2550_v54 = vld [vmem:[#allocation5 + $0x214] ss:$8 sps:$4 sm:$0xff]   ;;  %s2916_s20 = smov 32   ;;  %s2917_s21 = smov 64  }
  0x86   : > { %1411 = vmatpush1.bf16.msra.mxu1 %v2604_v60  ;;  %v2548_v56 = vld [vmem:[#allocation5 + $0x210] ss:$8 sps:$4 sm:$0xff]   ;;  %v2553_v15 = vld [vmem:[#allocation5 + $0x224] ss:$8 sps:$4 sm:$0xff]   ;;  %v2557_v60 = vld [vmem:[#allocation5 + $0x240] ss:$8 sps:$4 sm:$0xff]  }
  0x87   : > { %1412 = vmatprep.subr.bf16.mxu1 %v2605_v62  ;;  %v2554_v58 = vld [vmem:[#allocation5 + $0x230] ss:$8 sps:$4 sm:$0xff]   ;;  %v2701_v42 = vld [vmem:[#allocation7 + $0x240] ss:$8 sps:$4 sm:$0xff]   ;;  %vm1956_vm9 = vcmask 125952   ;;  %vm1974_vm10 = vcmask 1043456  }
  0x88   : > { %660 = vmatpush1.bf16.msra.mxu0 %v2472_v18  ;;  %v2524_v18 = vld [vmem:[#allocation5 + $0x90] ss:$8 sps:$4 sm:$0xff]   ;;  %s379_s25 = scalar_lea.vmem [#allocation8], %s2150_s28  ;;  %s2036_s28 = scalar_lea.sflag [#allocation4], %s3143_s19 }
  0x89   : > { %661 = vmatprep.subr.bf16.mxu0 %v2473_v19  ;;  %v2620_v19 = vld [vmem:[#allocation7 + $0x194] ss:$8 sps:$4 sm:$0xff]   ;;  %v2560_v62 = vld [vmem:[#allocation5 + $0x250] ss:$8 sps:$4 sm:$0xff]   ;;  %s2049_s18 = sshll.u32 %s379_s25, 4  ;;  %p3375_p0 = scmp.ne.s32.totalorder %s3366_s26, 0  ;;  %s3301_s18 = int_to_ptr.vmem [resolvable:$true] %s2049_s18 }
  0x8a   : > { %1413 = vmatpush1.bf16.msra.mxu1 %v2607_v0  ;;  %v2563_v0 = vld [vmem:[#allocation5 + $0x260] ss:$8 sps:$4 sm:$0xff]   ;;  %s2836_s17 = scalar_lea.vmem %s3301_s18, 512  ;;  %s2919_s14 = smov [#allocation8]  }
  0x8b   : > { %1414 = vmatprep.subr.bf16.mxu1 %v2608_v2  ;;  %v2566_v2 = vld [vmem:[#allocation5 + $0x270] ss:$8 sps:$4 sm:$0xff]   ;;  %p2837_p11 = scmp.ne.s32.totalorder %s3301_s18, %s2836_s17  ;;  %s2840_s16 = sshll.u32 %s2919_s14, 4  ;;  %s2841_s16 = int_to_ptr.vmem [resolvable:$false] %s2840_s16 }
  0x8c   : > { %662 = vmatpush1.bf16.msra.mxu0 %v2475_v20  ;;  %v2529_v20 = vld [vmem:[#allocation5 + $0xa4] ss:$8 sps:$4 sm:$0xff]   ;;  %p2843_p7 = scmp.lt.s32.totalorder %s3301_s18, %s2841_s16 }
  0x8d   : > { %663 = vmatprep.subr.bf16.mxu0 %v2476_v21  ;;  %v2622_v21 = vld [vmem:[#allocation7 + $0x190] ss:$8 sps:$4 sm:$0xff]   ;;  %p2838_p1 = pnand %p2837_p11, %p3375_p0 }
  0x8e   : > { %1415 = vmatpush1.bf16.msra.mxu1 %v2610_v5  ;;  %v2574_v5 = vld [vmem:[#allocation5 + $0x294] ss:$8 sps:$4 sm:$0xff]  }
  0x8f   : > { %1416 = vmatprep.subr.bf16.mxu1 %v2611_v6  ;;  %v2572_v6 = vld [vmem:[#allocation5 + $0x290] ss:$8 sps:$4 sm:$0xff]   ;;  %p2839_p3 = pneg %p2838_p1 }
  0x90   : > { %664 = vmatpush1.bf16.msra.mxu0 %v2478_v22  ;;  %v2527_v22 = vld [vmem:[#allocation5 + $0xa0] ss:$8 sps:$4 sm:$0xff]  }
  0x91   : > { %665 = vmatprep.subr.bf16.mxu0 %v2479_v23  ;;  %v2623_v23 = vld [vmem:[#allocation7 + $0x1a4] ss:$8 sps:$4 sm:$0xff]  }
  0x92   : > { %1417 = vmatpush1.bf16.msra.mxu1 %v2613_v8  ;;  %v2575_v8 = vld [vmem:[#allocation5 + $0x2a0] ss:$8 sps:$4 sm:$0xff]  }
  0x93   : > { %1418 = vmatprep.subr.bf16.mxu1 %v2614_v10  ;;  %v2578_v10 = vld [vmem:[#allocation5 + $0x2b0] ss:$8 sps:$4 sm:$0xff]  }
  0x94   : > { %666 = vmatpush1.bf16.msra.mxu0 %v2481_v24  ;;  %v2532_v24 = vld [vmem:[#allocation5 + $0xb4] ss:$8 sps:$4 sm:$0xff]  }
  0x95   : > { %667 = vmatprep.subr.bf16.mxu0 %v2482_v25  ;;  %v2625_v25 = vld [vmem:[#allocation7 + $0x1a0] ss:$8 sps:$4 sm:$0xff]  }
  0x96   : > { %1419 = vmatpush1.bf16.msra.mxu1 %v2616_v12  ;;  %v2581_v12 = vld [vmem:[#allocation5 + $0x2c0] ss:$8 sps:$4 sm:$0xff]  }
  0x97   : > { %1420 = vmatprep.subr.bf16.mxu1 %v2617_v14  ;;  %v2584_v14 = vld [vmem:[#allocation5 + $0x2d0] ss:$8 sps:$4 sm:$0xff]  }
  0x98   : > { %668 = vmatpush1.bf16.msra.mxu0 %v2484_v26  ;;  %v2530_v26 = vld [vmem:[#allocation5 + $0xb0] ss:$8 sps:$4 sm:$0xff]  }
  0x99   : > { %669 = vmatprep.subr.bf16.mxu0 %v2485_v27  ;;  %v2626_v27 = vld [vmem:[#allocation7 + $0x1b4] ss:$8 sps:$4 sm:$0xff]  }
  0x9a   : > { %1421 = vmatpush1.bf16.msra.mxu1 %v2619_v17  ;;  %v2587_v17 = vld [vmem:[#allocation5 + $0x2e0] ss:$8 sps:$4 sm:$0xff]  }
  0x9b   : > { %1422 = vmatprep.subr.bf16.mxu1 %v2620_v19  ;;  %v2592_v19 = vld [vmem:[#allocation5 + $0x2f4] ss:$8 sps:$4 sm:$0xff]  }
  0x9c   : > { %670 = vmatpush1.bf16.msra.mxu0 %v2487_v28  ;;  %v2535_v28 = vld [vmem:[#allocation5 + $0xc4] ss:$8 sps:$4 sm:$0xff]  }
  0x9d   : > { %671 = vmatprep.subr.bf16.mxu0 %v2488_v29  ;;  %v2628_v29 = vld [vmem:[#allocation7 + $0x1b0] ss:$8 sps:$4 sm:$0xff]  }
  0x9e   : > { %1423 = vmatpush1.bf16.msra.mxu1 %v2622_v21 }
  0x9f   : > { %1424 = vmatprep.subr.bf16.mxu1 %v2623_v23  ;;  %v2635_v23 = vld [vmem:[#allocation7 + $0x1e4] ss:$8 sps:$4 sm:$0xff]  }
  0xa0   : > { %672 = vmatpush1.bf16.msra.mxu0 %v2490_v30  ;;  %v2533_v30 = vld [vmem:[#allocation5 + $0xc0] ss:$8 sps:$4 sm:$0xff]  }
  0xa1   : > { %673 = vmatprep.subr.bf16.mxu0 %v2491_v31  ;;  %v2629_v31 = vld [vmem:[#allocation7 + $0x1c4] ss:$8 sps:$4 sm:$0xff]  }
  0xa2   : > { %1425 = vmatpush1.bf16.msra.mxu1 %v2625_v25  ;;  %v2638_v25 = vld [vmem:[#allocation7 + $0x1f4] ss:$8 sps:$4 sm:$0xff]  }
  0xa3   : > { %1426 = vmatprep.subr.bf16.mxu1 %v2626_v27  ;;  %v2643_v27 = vld [vmem:[#allocation7 + $0x4] ss:$8 sps:$4 sm:$0xff]  }
  0xa4   : > { %674 = vmatpush1.bf16.msra.mxu0 %v2493_v33  ;;  %v2538_v33 = vld [vmem:[#allocation5 + $0xd4] ss:$8 sps:$4 sm:$0xff]  }
  0xa5   : > { %675 = vmatprep.subr.bf16.mxu0 %v2494_v34  ;;  %v2631_v34 = vld [vmem:[#allocation7 + $0x1c0] ss:$8 sps:$4 sm:$0xff]  }
  0xa6   : > { %1427 = vmatpush1.bf16.msra.mxu1 %v2628_v29 }
  0xa7   : > { %1428 = vmatprep.subr.bf16.mxu1 %v2629_v31 }
  0xa8   : > { %676 = vmatpush1.bf16.msra.mxu0 %v2496_v37  ;;  %v2536_v37 = vld [vmem:[#allocation5 + $0xd0] ss:$8 sps:$4 sm:$0xff]  }
  0xa9   : > { %848 = vmatprep.subr.bf16.mxu0 %v2499_v40  ;;  %v2634_v40 = vld [vmem:[#allocation7 + $0x1d0] ss:$8 sps:$4 sm:$0xff]  }
  0xaa   : > { %1429 = vmatpush1.bf16.msra.mxu1 %v2631_v34 }
  0xab   : > { %678 = vmatmul.mubr.bf16.vlgmr.msra.gmra.mrb[0].mxu0 %v3176_v43  ;;  %1430 = vmatprep.subr.bf16.mxu1 %v2632_v38 }
  0xac   : > { %849 = vmatpush1.bf16.msra.mxu0 %v2497_v44  ;;  %880 = vmatprep.mubr.bf16.mxu0 %v408_v46  ;;  %v391_v44 = vrot.slane %v389_v35, 7  ;;  %v2544_v46 = vld [vmem:[#allocation5 + $0xf4] ss:$8 sps:$4 sm:$0xff]  }
  0xad   : > { %850 = vmatprep.subr.bf16.mxu0 %v2502_v45  ;;  %v392_v45 = vshll.u32 %v3176_v43, 16 }
  0xae   : > { %1431 = vmatpush1.bf16.msra.mxu1 %v2634_v40 }
  0xaf   : > { %v394_v49 = vor.u32 %v392_v45, %v391_v44  ;;  %1432 = vmatprep.subr.bf16.mxu1 %v2635_v23  ;;  %v2685_v23 = vld [vmem:[#allocation7 + $0xe4] ss:$8 sps:$4 sm:$0xff]  }
  0xb0   : > { %851 = vmatpush1.bf16.msra.mxu0 %v2500_v47  ;;  %v411_v47 = vrot.slane %v399_v36, 1 }
  0xb1   : > { %852 = vmatprep.subr.bf16.mxu0 %v2505_v48  ;;  %v2542_v48 = vld [vmem:[#allocation5 + $0xf0] ss:$8 sps:$4 sm:$0xff]   ;;  %v407_v36 = vsel %vm3172_vm2, 0, %v394_v49 }
  0xb2   : > { %v412_v51 = vor.u32 %v411_v47, %v396_v32  ;;  %v2551_v32 = vld [vmem:[#allocation5 + $0x220] ss:$8 sps:$4 sm:$0xff]  }
  0xb4   : > { %853 = vmatpush1.bf16.msra.mxu0 %v2503_v53  ;;  %v2545_v53 = vld [vmem:[#allocation5 + $0x200] ss:$8 sps:$4 sm:$0xff]  }
  0xb5   : > { %854 = vmatprep.subr.bf16.mxu0 %v2508_v55  ;;  %v419_v55 = vsel %vm3191_vm5, %v412_v51, 0 }
  0xb8   : > { %855 = vmatpush1.bf16.msra.mxu0 %v2506_v57  ;;  %v2556_v57 = vld [vmem:[#allocation5 + $0x234] ss:$8 sps:$4 sm:$0xff]  }
  0xb9   : > { %856 = vmatprep.subr.bf16.mxu0 %v2511_v59  ;;  %v2559_v59 = vld [vmem:[#allocation5 + $0x244] ss:$8 sps:$4 sm:$0xff]  }
  0xbc   : > { %857 = vmatpush1.bf16.msra.mxu0 %v2509_v61  ;;  %v2562_v61 = vld [vmem:[#allocation5 + $0x254] ss:$8 sps:$4 sm:$0xff]  }
  0xbd   : > { %858 = vmatprep.subr.bf16.mxu0 %v2514_v63  ;;  %v2565_v63 = vld [vmem:[#allocation5 + $0x264] ss:$8 sps:$4 sm:$0xff]  }
  0xc0   : > { %859 = vmatpush1.bf16.msra.mxu0 %v2512_v1  ;;  %v2568_v1 = vld [vmem:[#allocation5 + $0x274] ss:$8 sps:$4 sm:$0xff]  }
  0xc1   : > { %860 = vmatprep.subr.bf16.mxu0 %v2517_v3  ;;  %v2571_v3 = vld [vmem:[#allocation5 + $0x284] ss:$8 sps:$4 sm:$0xff]  }
  0xc4   : > { %861 = vmatpush1.bf16.msra.mxu0 %v2515_v4  ;;  %v2569_v4 = vld [vmem:[#allocation5 + $0x280] ss:$8 sps:$4 sm:$0xff]  }
  0xc5   : > { %862 = vmatprep.subr.bf16.mxu0 %v2520_v7  ;;  %v2577_v7 = vld [vmem:[#allocation5 + $0x2a4] ss:$8 sps:$4 sm:$0xff]  }
  0xc8   : > { %863 = vmatpush1.bf16.msra.mxu0 %v2518_v9  ;;  %v2580_v9 = vld [vmem:[#allocation5 + $0x2b4] ss:$8 sps:$4 sm:$0xff]  }
  0xc9   : > { %864 = vmatprep.subr.bf16.mxu0 %v2523_v11  ;;  %v2583_v11 = vld [vmem:[#allocation5 + $0x2c4] ss:$8 sps:$4 sm:$0xff]  }
  0xcc   : > { %865 = vmatpush1.bf16.msra.mxu0 %v2521_v13  ;;  %v2586_v13 = vld [vmem:[#allocation5 + $0x2d4] ss:$8 sps:$4 sm:$0xff]  }
  0xcd   : > { %866 = vmatprep.subr.bf16.mxu0 %v2526_v16  ;;  %v2589_v16 = vld [vmem:[#allocation5 + $0x2e4] ss:$8 sps:$4 sm:$0xff]  }
  0xd0   : > { %867 = vmatpush1.bf16.msra.mxu0 %v2524_v18  ;;  %v409_v18 = vrot.slane %v392_v45, 1 }
  0xd1   : > { %868 = vmatprep.subr.bf16.mxu0 %v2529_v20  ;;  %v2590_v20 = vld [vmem:[#allocation5 + $0x2f0] ss:$8 sps:$4 sm:$0xff]  }
  0xd2   : > { %v410_v21 = vor.u32 %v409_v18, %v389_v35  ;;  %v2674_v18 = vld [vmem:[#allocation7 + $0xb0] ss:$8 sps:$4 sm:$0xff]  }
  0xd4   : > { %869 = vmatpush1.bf16.msra.mxu0 %v2527_v22  ;;  %v418_v22 = vsel %vm3191_vm5, %v410_v21, 0  ;;  %v2682_v21 = vld [vmem:[#allocation7 + $0xd4] ss:$8 sps:$4 sm:$0xff]  }
  0xd5   : > { %870 = vmatprep.subr.bf16.mxu0 %v2532_v24  ;;  %v2637_v24 = vld [vmem:[#allocation7 + $0x1e0] ss:$8 sps:$4 sm:$0xff]  }
  0xd6   : > { %1433 = vmatpush1.bf16.msra.mxu1 %v2637_v24  ;;  %v2683_v24 = vld [vmem:[#allocation7 + $0xe0] ss:$8 sps:$4 sm:$0xff]  }
  0xd7   : > { %1434 = vmatprep.subr.bf16.mxu1 %v2638_v25  ;;  %v2688_v25 = vld [vmem:[#allocation7 + $0xf4] ss:$8 sps:$4 sm:$0xff]  }
  0xd8   : > { %871 = vmatpush1.bf16.msra.mxu0 %v2530_v26  ;;  %v2640_v26 = vld [vmem:[#allocation7 + $0x1f0] ss:$8 sps:$4 sm:$0xff]  }
  0xd9   : > { %872 = vmatprep.subr.bf16.mxu0 %v2535_v28  ;;  %v1132_v28 = vlaneseq }
  0xda   : > { %1435 = vmatpush1.bf16.msra.mxu1 %v2640_v26 }
  0xdb   : > { %1607 = vmatprep.subr.bf16.mxu1 %v2643_v27  ;;  %v1133_v43 = vshrl.u32 %v1132_v28, 7 }
  0xdc   : > { %873 = vmatpush1.bf16.msra.mxu0 %v2533_v30  ;;  %v385_v30 = vld [vmem:[%s3348_s2] sm:$0x3] }
  0xdd   : > { %874 = vmatprep.subr.bf16.mxu0 %v2538_v33  ;;  %v3206_v29 = vsub.s32 0, %v1133_v43  ;;  %v3211_v31 = vsub.s32 1, %v1133_v43  ;;  %v2686_v43 = vld [vmem:[#allocation7 + $0xf0] ss:$8 sps:$4 sm:$0xff]  }
  0xdf   : > { %v1135_v33 = vrot.slane %v385_v30, %v3206_v29  ;;  %v1139_v34 = vrot.slane %v385_v30, %v3211_v31  ;;  %v2691_v30 = vld [vmem:[#allocation7 + $0x204] ss:$8 sps:$4 sm:$0xff]  }
  0xe0   : > { %875 = vmatpush1.bf16.msra.mxu0 %v2536_v37 }
  0xe1   : > { %876 = vmatprep.subr.bf16.mxu0 %v2541_v39 }
  0xe4   : > { %877 = vmatpush1.bf16.msra.mxu0 %v2539_v41 }
  0xe5   : > { %878 = vmatprep.subr.bf16.mxu0 %v2544_v46 }
  0xe8   : > { %879 = vmatpush1.bf16.msra.mxu0 %v2542_v48 }
  0xe9   : > { %1084 = vmatprep.subr.bf16.mxu0 %v2547_v50 }
  0xeb   : > { %881 = vmatmul.mubr.bf16.vlgmr.msra.gmra.mrb[0].mxu0 %v407_v36  ;;  %v2646_v36 = vld [vmem:[#allocation7 + $0x14] ss:$8 sps:$4 sm:$0xff]  }
  0xec   : > { %1085 = vmatpush1.bf16.msra.mxu0 %v2545_v53  ;;  %1116 = vmatprep.mubr.bf16.mxu0 %v419_v55  ;;  %v2641_v53 = vld [vmem:[#allocation7] ss:$8 sps:$4 sm:$0xff]  }
  0xed   : > { %1086 = vmatprep.subr.bf16.mxu0 %v2550_v54 }
  0xf0   : > { %1087 = vmatpush1.bf16.msra.mxu0 %v2548_v56 }
  0xf1   : > { %1088 = vmatprep.subr.bf16.mxu0 %v2553_v15 }
  0xf4   : > { %1089 = vmatpush1.bf16.msra.mxu0 %v2551_v32  ;;  %v2644_v32 = vld [vmem:[#allocation7 + $0x10] ss:$8 sps:$4 sm:$0xff]  }
  0xf5   : > { %1090 = vmatprep.subr.bf16.mxu0 %v2556_v57 }
  0xf8   : > { %1091 = vmatpush1.bf16.msra.mxu0 %v2554_v58 }
  0xf9   : > { %1092 = vmatprep.subr.bf16.mxu0 %v2559_v59  ;;  %v2649_v59 = vld [vmem:[#allocation7 + $0x24] ss:$8 sps:$4 sm:$0xff]  }
  0xfc   : > { %1093 = vmatpush1.bf16.msra.mxu0 %v2557_v60 }
  0xfd   : > { %1094 = vmatprep.subr.bf16.mxu0 %v2562_v61 }
 0x100   : > { %1095 = vmatpush1.bf16.msra.mxu0 %v2560_v62 }
 0x101   : > { %1096 = vmatprep.subr.bf16.mxu0 %v2565_v63  ;;  %v2647_v63 = vld [vmem:[#allocation7 + $0x20] ss:$8 sps:$4 sm:$0xff]  }
 0x104   : > { %1097 = vmatpush1.bf16.msra.mxu0 %v2563_v0  ;;  %v2652_v0 = vld [vmem:[#allocation7 + $0x34] ss:$8 sps:$4 sm:$0xff]  }
 0x105   : > { %1098 = vmatprep.subr.bf16.mxu0 %v2568_v1  ;;  %v2650_v1 = vld [vmem:[#allocation7 + $0x30] ss:$8 sps:$4 sm:$0xff]  }
 0x108   : > { %1099 = vmatpush1.bf16.msra.mxu0 %v2566_v2  ;;  %v2655_v2 = vld [vmem:[#allocation7 + $0x44] ss:$8 sps:$4 sm:$0xff]  }
 0x109   : > { %1100 = vmatprep.subr.bf16.mxu0 %v2571_v3  ;;  %v2653_v3 = vld [vmem:[#allocation7 + $0x40] ss:$8 sps:$4 sm:$0xff]  }
 0x10c   : > { %1101 = vmatpush1.bf16.msra.mxu0 %v2569_v4  ;;  %v2658_v4 = vld [vmem:[#allocation7 + $0x54] ss:$8 sps:$4 sm:$0xff]  }
 0x10d   : > { %1102 = vmatprep.subr.bf16.mxu0 %v2574_v5  ;;  %v2656_v5 = vld [vmem:[#allocation7 + $0x50] ss:$8 sps:$4 sm:$0xff]  }
 0x110   : > { %1103 = vmatpush1.bf16.msra.mxu0 %v2572_v6  ;;  %v2661_v6 = vld [vmem:[#allocation7 + $0x64] ss:$8 sps:$4 sm:$0xff]  }
 0x111   : > { %1104 = vmatprep.subr.bf16.mxu0 %v2577_v7  ;;  %v2659_v7 = vld [vmem:[#allocation7 + $0x60] ss:$8 sps:$4 sm:$0xff]  }
 0x114   : > { %1105 = vmatpush1.bf16.msra.mxu0 %v2575_v8  ;;  %v2664_v8 = vld [vmem:[#allocation7 + $0x74] ss:$8 sps:$4 sm:$0xff]  }
 0x115   : > { %1106 = vmatprep.subr.bf16.mxu0 %v2580_v9  ;;  %v2662_v9 = vld [vmem:[#allocation7 + $0x70] ss:$8 sps:$4 sm:$0xff]  }
 0x118   : > { %1107 = vmatpush1.bf16.msra.mxu0 %v2578_v10  ;;  %v2667_v10 = vld [vmem:[#allocation7 + $0x84] ss:$8 sps:$4 sm:$0xff]  }
 0x119   : > { %1108 = vmatprep.subr.bf16.mxu0 %v2583_v11  ;;  %v2665_v11 = vld [vmem:[#allocation7 + $0x80] ss:$8 sps:$4 sm:$0xff]  }
 0x11c   : > { %1109 = vmatpush1.bf16.msra.mxu0 %v2581_v12  ;;  %v2670_v12 = vld [vmem:[#allocation7 + $0x94] ss:$8 sps:$4 sm:$0xff]  }
 0x11d   : > { %1110 = vmatprep.subr.bf16.mxu0 %v2586_v13  ;;  %v2668_v13 = vld [vmem:[#allocation7 + $0x90] ss:$8 sps:$4 sm:$0xff]  }
 0x120   : > { %1111 = vmatpush1.bf16.msra.mxu0 %v2584_v14  ;;  %v2673_v14 = vld [vmem:[#allocation7 + $0xa4] ss:$8 sps:$4 sm:$0xff]  }
 0x121   : > { %1112 = vmatprep.subr.bf16.mxu0 %v2589_v16  ;;  %v2671_v16 = vld [vmem:[#allocation7 + $0xa0] ss:$8 sps:$4 sm:$0xff]  }
 0x124   : > { %1113 = vmatpush1.bf16.msra.mxu0 %v2587_v17  ;;  %v2676_v17 = vld [vmem:[#allocation7 + $0xb4] ss:$8 sps:$4 sm:$0xff]  }
 0x125   : > { %1114 = vmatprep.subr.bf16.mxu0 %v2592_v19  ;;  %v2679_v19 = vld [vmem:[#allocation7 + $0xc4] ss:$8 sps:$4 sm:$0xff]  }
 0x128   : > { %1115 = vmatpush1.bf16.msra.mxu0 %v2590_v20  ;;  %v2677_v20 = vld [vmem:[#allocation7 + $0xc0] ss:$8 sps:$4 sm:$0xff]  }
 0x12b   : > { %1117 = vmatmul.mubr.bf16.vlgmr.msra.gmra.mrb[0].mxu0 %v418_v22  ;;  %v2680_v22 = vld [vmem:[#allocation7 + $0xd0] ss:$8 sps:$4 sm:$0xff]  }
 0x1fe   : > { %v1118_v35 = vpop.f32.mrb[0].mxu0 }
 0x1ff   : > { %v1142_v37 = vadd.f32 %v1135_v33, %v1118_v35  ;;  %v1120_v38 = vpop.f32.mrb[1].mxu0  ;;  %v2689_v35 = vld [vmem:[#allocation7 + $0x200] ss:$8 sps:$4 sm:$0xff]  }
 0x200   : > { %v1143_v39 = vadd.f32 %v1139_v34, %v1120_v38  ;;  %v1122_v40 = vpop.f32.mrb[2].mxu0 }
 0x201   : > { %v1144_v41 = vadd.f32 %v1135_v33, %v1122_v40  ;;  %v1124_v44 = vpop.f32.mrb[3].mxu0  ;;  %v1146_v46 = vmax.f32 %v1142_v37, 0.0  ;;  %v2694_v37 = vld [vmem:[#allocation7 + $0x214] ss:$8 sps:$4 sm:$0xff]   ;;  %v2692_v40 = vld [vmem:[#allocation7 + $0x210] ss:$8 sps:$4 sm:$0xff]  }
 0x202   : > { %v1145_v45 = vadd.f32 %v1139_v34, %v1124_v44  ;;  %v1147_v48 = vmax.f32 %v1143_v39, 0.0  ;;  %v2695_v44 = vld [vmem:[#allocation7 + $0x220] ss:$8 sps:$4 sm:$0xff]  }
 0x203   : > { %v1148_v47 = vmax.f32 %v1144_v41, 0.0  ;;  %v2697_v41 = vld [vmem:[#allocation7 + $0x224] ss:$8 sps:$4 sm:$0xff]  }
 0x204   : > { %v1149_v49 = vmax.f32 %v1145_v45, 0.0  ;;  %v2700_v45 = vld [vmem:[#allocation7 + $0x234] ss:$8 sps:$4 sm:$0xff]  }
 0x205   : > { %v3215_v50 = vpack.c.bf16 %v1148_v47, %v1146_v46  ;;  %v2698_v46 = vld [vmem:[#allocation7 + $0x230] ss:$8 sps:$4 sm:$0xff]   ;;  %v2703_v47 = vld [vmem:[#allocation7 + $0x244] ss:$8 sps:$4 sm:$0xff]  }
 0x206   : > { %v3217_v51 = vpack.c.bf16 %v1149_v49, %v1147_v48  ;;  %v2706_v48 = vld [vmem:[#allocation7 + $0x254] ss:$8 sps:$4 sm:$0xff]   ;;  %v2704_v49 = vld [vmem:[#allocation7 + $0x250] ss:$8 sps:$4 sm:$0xff]  }
 0x207   : > { %v1157_v54 = vshll.u32 %v3215_v50, 16  ;;  %v1154_v56 = vshrl.u32 %v3215_v50, 16 }
 0x208   : > { %v1161_v55 = vshrl.u32 %v3217_v51, 16  ;;  %1436 = vmatprep.mubr.bf16.mxu1 %v3217_v51  ;;  %v1164_v58 = vshll.u32 %v3217_v51, 16  ;;  %v2707_v51 = vld [vmem:[#allocation7 + $0x260] ss:$8 sps:$4 sm:$0xff]  }
 0x209   : > { %1437 = vmatmul.mubr.bf16.vlgmr.msra.gmra.mrb[0].mxu1 %v3215_v50  ;;  %v1171_v15 = vrot.slane %v1157_v54, 1  ;;  %v1156_v26 = vrot.slane %v1154_v56, 7  ;;  %v2709_v50 = vld [vmem:[#allocation7 + $0x264] ss:$8 sps:$4 sm:$0xff]  }
 0x20a   : > { %1608 = vmatpush1.bf16.msra.mxu1 %v2641_v53  ;;  %v1163_v57 = vrot.slane %v1161_v55, 7  ;;  %v1173_v27 = vrot.slane %v1164_v58, 1  ;;  %v2712_v53 = vld [vmem:[#allocation7 + $0x274] ss:$8 sps:$4 sm:$0xff]  }
 0x20b   : > { %1609 = vmatprep.subr.bf16.mxu1 %v2646_v36  ;;  %v3231_v60 = vor.u32 %v1171_v15, %v1154_v56  ;;  %v1159_v33 = vor.u32 %v1157_v54, %v1156_v26  ;;  %v2710_v36 = vld [vmem:[#allocation7 + $0x270] ss:$8 sps:$4 sm:$0xff]   ;;  %v2715_v54 = vld [vmem:[#allocation7 + $0x284] ss:$8 sps:$4 sm:$0xff]   ;;  %v2718_v56 = vld [vmem:[#allocation7 + $0x294] ss:$8 sps:$4 sm:$0xff]  }
 0x20c   : > { %v1166_v61 = vor.u32 %v1164_v58, %v1163_v57  ;;  %v1174_v34 = vor.u32 %v1173_v27, %v1161_v55  ;;  %v2713_v55 = vld [vmem:[#allocation7 + $0x280] ss:$8 sps:$4 sm:$0xff]   ;;  %v2716_v15 = vld [vmem:[#allocation7 + $0x290] ss:$8 sps:$4 sm:$0xff]   ;;  %v2724_v58 = vld [vmem:[#allocation7 + $0x2b4] ss:$8 sps:$4 sm:$0xff]  }
 0x20d   : > { %v1169_v38 = vsel %vm3172_vm2, 0, %v1159_v33  ;;  %v2719_v57 = vld [vmem:[#allocation7 + $0x2a0] ss:$8 sps:$4 sm:$0xff]   ;;  %v1924_v33 = vand.u32 127, %v1132_v28 }
 0x20e   : > { %1610 = vmatpush1.bf16.msra.mxu1 %v2644_v32  ;;  %v1170_v62 = vsel %vm3172_vm2, 0, %v1166_v61  ;;  %v1178_v39 = vsel %vm3191_vm5, %v1174_v34, 0  ;;  %v2721_v32 = vld [vmem:[#allocation7 + $0x2a4] ss:$8 sps:$4 sm:$0xff]  }
 0x20f   : > { %1639 = vmatprep.mubr.bf16.mxu1 %v1170_v62  ;;  %1611 = vmatprep.subr.bf16.mxu1 %v2649_v59  ;;  %v2722_v59 = vld [vmem:[#allocation7 + $0x2b0] ss:$8 sps:$4 sm:$0xff]   ;;  %v2727_v61 = vld [vmem:[#allocation7 + $0x2c4] ss:$8 sps:$4 sm:$0xff]   ;;  %v2725_v62 = vld [vmem:[#allocation7 + $0x2c0] ss:$8 sps:$4 sm:$0xff]  }
 0x210   : > { %vm1925_vm6 = vcmp.lt.s32.totalorder %v1924_v33, 16  ;;  %vm1934_vm7 = vcmp.lt.s32.totalorder %v1924_v33, 32  ;;  %vm1943_vm8 = vcmp.lt.s32.totalorder %v1924_v33, 64 }
 0x212   : > { %1612 = vmatpush1.bf16.msra.mxu1 %v2647_v63  ;;  %v2730_v63 = vld [vmem:[#allocation7 + $0x2d4] ss:$8 sps:$4 sm:$0xff]  }
 0x213   : > { %1613 = vmatprep.subr.bf16.mxu1 %v2652_v0  ;;  %v2728_v0 = vld [vmem:[#allocation7 + $0x2d0] ss:$8 sps:$4 sm:$0xff]  }
 0x216   : > { %1614 = vmatpush1.bf16.msra.mxu1 %v2650_v1  ;;  %v2733_v1 = vld [vmem:[#allocation7 + $0x2e4] ss:$8 sps:$4 sm:$0xff]  }
 0x217   : > { %1615 = vmatprep.subr.bf16.mxu1 %v2655_v2  ;;  %v2731_v2 = vld [vmem:[#allocation7 + $0x2e0] ss:$8 sps:$4 sm:$0xff]  }
 0x21a   : > { %1616 = vmatpush1.bf16.msra.mxu1 %v2653_v3  ;;  %v2736_v3 = vld [vmem:[#allocation7 + $0x2f4] ss:$8 sps:$4 sm:$0xff]  }
 0x21b   : > { %1617 = vmatprep.subr.bf16.mxu1 %v2658_v4  ;;  %v2734_v4 = vld [vmem:[#allocation7 + $0x2f0] ss:$8 sps:$4 sm:$0xff]  }
 0x21e   : > { %1618 = vmatpush1.bf16.msra.mxu1 %v2656_v5  ;;  %v1177_v5 = vsel %vm3191_vm5, %v3231_v60, 0 }
 0x21f   : > { %1619 = vmatprep.subr.bf16.mxu1 %v2661_v6  ;;  %v1150_v6 = vld [vmem:[%s3350_s4] sm:$0x3] }
 0x222   : > { %1620 = vmatpush1.bf16.msra.mxu1 %v2659_v7  ;;  %v1894_v7 = vrot.slane %v1150_v6, %v3206_v29 }
 0x223   : > { %1621 = vmatprep.subr.bf16.mxu1 %v2664_v8 }
 0x226   : > { %1622 = vmatpush1.bf16.msra.mxu1 %v2662_v9  ;;  %v1898_v9 = vrot.slane %v1150_v6, %v3211_v31 }
 0x227   : > { %1623 = vmatprep.subr.bf16.mxu1 %v2667_v10 }
 0x22a   : > { %1624 = vmatpush1.bf16.msra.mxu1 %v2665_v11 }
 0x22b   : > { %1625 = vmatprep.subr.bf16.mxu1 %v2670_v12 }
 0x22e   : > { %1626 = vmatpush1.bf16.msra.mxu1 %v2668_v13 }
 0x22f   : > { %1627 = vmatprep.subr.bf16.mxu1 %v2673_v14 }
 0x232   : > { %1628 = vmatpush1.bf16.msra.mxu1 %v2671_v16 }
 0x233   : > { %1629 = vmatprep.subr.bf16.mxu1 %v2676_v17 }
 0x236   : > { %1630 = vmatpush1.bf16.msra.mxu1 %v2674_v18 }
 0x237   : > { %1631 = vmatprep.subr.bf16.mxu1 %v2679_v19 }
 0x23a   : > { %1632 = vmatpush1.bf16.msra.mxu1 %v2677_v20 }
 0x23b   : > { %1633 = vmatprep.subr.bf16.mxu1 %v2682_v21 }
 0x23e   : > { %1634 = vmatpush1.bf16.msra.mxu1 %v2680_v22 }
 0x23f   : > { %1635 = vmatprep.subr.bf16.mxu1 %v2685_v23 }
 0x242   : > { %1636 = vmatpush1.bf16.msra.mxu1 %v2683_v24 }
 0x243   : > { %1637 = vmatprep.subr.bf16.mxu1 %v2688_v25 }
 0x246   : > { %1638 = vmatpush1.bf16.msra.mxu1 %v2686_v43 }
 0x247   : > { %1843 = vmatprep.subr.bf16.mxu1 %v2691_v30 }
 0x249   : > { %1640 = vmatmul.mubr.bf16.vlgmr.msra.gmra.mrb[0].mxu1 %v1169_v38 }
 0x24a   : > { %1844 = vmatpush1.bf16.msra.mxu1 %v2689_v35  ;;  %1875 = vmatprep.mubr.bf16.mxu1 %v1178_v39 }
 0x24b   : > { %1845 = vmatprep.subr.bf16.mxu1 %v2694_v37 }
 0x24e   : > { %1846 = vmatpush1.bf16.msra.mxu1 %v2692_v40 }
 0x24f   : > { %1847 = vmatprep.subr.bf16.mxu1 %v2697_v41 }
 0x252   : > { %1848 = vmatpush1.bf16.msra.mxu1 %v2695_v44 }
 0x253   : > { %1849 = vmatprep.subr.bf16.mxu1 %v2700_v45 }
 0x256   : > { %1850 = vmatpush1.bf16.msra.mxu1 %v2698_v46 }
 0x257   : > { %1851 = vmatprep.subr.bf16.mxu1 %v2703_v47 }
 0x25a   : > { %1852 = vmatpush1.bf16.msra.mxu1 %v2701_v42 }
 0x25b   : > { %1853 = vmatprep.subr.bf16.mxu1 %v2706_v48 }
 0x25e   : > { %1854 = vmatpush1.bf16.msra.mxu1 %v2704_v49 }
 0x25f   : > { %1855 = vmatprep.subr.bf16.mxu1 %v2709_v50 }
 0x262   : > { %1856 = vmatpush1.bf16.msra.mxu1 %v2707_v51 }
 0x263   : > { %1857 = vmatprep.subr.bf16.mxu1 %v2712_v53 }
 0x266   : > { %1858 = vmatpush1.bf16.msra.mxu1 %v2710_v36 }
 0x267   : > { %1859 = vmatprep.subr.bf16.mxu1 %v2715_v54 }
 0x26a   : > { %1860 = vmatpush1.bf16.msra.mxu1 %v2713_v55  ;;  %v1950_v55 = vld [vmem:[%s3351_s5] sm:$0xf] }
 0x26b   : > { %1861 = vmatprep.subr.bf16.mxu1 %v2718_v56 }
 0x26e   : > { %1862 = vmatpush1.bf16.msra.mxu1 %v2716_v15 }
 0x26f   : > { %1863 = vmatprep.subr.bf16.mxu1 %v2721_v32 }
 0x272   : > { %1864 = vmatpush1.bf16.msra.mxu1 %v2719_v57  ;;  %v2918_v57 = vmov 0  }
 0x273   : > { %1865 = vmatprep.subr.bf16.mxu1 %v2724_v58  ;;  %2447 = vset.pattern.permute.xlu1 %v2918_v57  ;;  %v1960_v58 = vld [vmem:[%s3352_s6] sm:$0xf] }
 0x274   : > { %2448 = vset.pattern.permute.xlu0 %v2918_v57 }
 0x276   : > { %1866 = vmatpush1.bf16.msra.mxu1 %v2722_v59 }
 0x277   : > { %1867 = vmatprep.subr.bf16.mxu1 %v2727_v61 }
 0x27a   : > { %1868 = vmatpush1.bf16.msra.mxu1 %v2725_v62 }
 0x27b   : > { %1869 = vmatprep.subr.bf16.mxu1 %v2730_v63  ;;  %v1963_v63 = vld [vmem:[%s3353_s7] sm:$0xff] }
 0x27e   : > { %1870 = vmatpush1.bf16.msra.mxu1 %v2728_v0  ;;  %v1970_v0 = vcombine.high %v1963_v63, %v1963_v63 }
 0x27f   : > { %1871 = vmatprep.subr.bf16.mxu1 %v2733_v1 }
 0x282   : > { %1872 = vmatpush1.bf16.msra.mxu1 %v2731_v2 }
 0x283   : > { %1873 = vmatprep.subr.bf16.mxu1 %v2736_v3 }
 0x286   : > { %1874 = vmatpush1.bf16.msra.mxu1 %v2734_v4 }
 0x289   : > { %1876 = vmatmul.mubr.bf16.vlgmr.msra.gmra.mrb[0].mxu1 %v1177_v5 }
 0x35c   : > { %v1877_v8 = vpop.f32.mrb[0].mxu1 }
 0x35d   : > { %v1879_v10 = vpop.f32.mrb[1].mxu1  ;;  %v3253_v12 = vadd.f32 %v1894_v7, %v1877_v8 }
 0x35e   : > { %v1881_v11 = vpop.f32.mrb[2].mxu1  ;;  %v3257_v16 = vadd.f32 %v1898_v9, %v1879_v10 }
 0x35f   : > { %v3255_v13 = vadd.f32 %v1894_v7, %v1881_v11  ;;  %v1883_v14 = vpop.f32.mrb[3].mxu1 }
 0x360   : > { %v3259_v52 = vadd.f32 %v1898_v9, %v1883_v14  ;;  %v1989_v14 = vld [vmem:[%s3354_s8] sm:$0x3] }
 0x361   : > { %v1905_v60 = vadd.f32 %v3255_v13, %v3253_v12 }
 0x362   : > { %v1912_v17 = vadd.f32 %v3259_v52, %v3257_v16 }
 0x363   : > { %v1906_v18 = vrot.slane %v1905_v60, 4 }
 0x364   : > { %v1913_v19 = vrot.slane %v1912_v17, 4 }
 0x365   : > { %v1907_v20 = vadd.f32 %v1906_v18, %v1905_v60  ;;  %v1994_v18 = vrot.slane %v1989_v14, %v3206_v29 }
 0x366   : > { %v1914_v21 = vadd.f32 %v1913_v19, %v1912_v17  ;;  %v1998_v19 = vrot.slane %v1989_v14, %v3211_v31 }
 0x367   : > { %v1908_v22 = vrot.slane %v1907_v20, 2 }
 0x368   : > { %v1915_v23 = vrot.slane %v1914_v21, 2 }
 0x369   : > { %v1909_v24 = vadd.f32 %v1908_v22, %v1907_v20 }
 0x36a   : > { %v1916_v25 = vadd.f32 %v1915_v23, %v1914_v21 }
 0x36b   : > { %v1910_v26 = vrot.slane %v1909_v24, 1 }
 0x36c   : > { %v1917_v43 = vrot.slane %v1916_v25, 1 }
 0x36d   : > { %v1911_v27 = vadd.f32 %v1910_v26, %v1909_v24 }
 0x36e   : > { %v1918_v30 = vadd.f32 %v1917_v43, %v1916_v25 }
 0x36f   : > { %1919 = vrot.lane.b32.xlu0 %v1911_v27, %s2915_s23 }
 0x373   : > { %1921 = vrot.lane.b32.xlu0 %v1918_v30, %s2915_s23 }
 0x3e1   : > { %v1920_v34 = vpop.permute.xlu0 %1919 }
 0x3e5   : > { %v1922_v35 = vpop.permute.xlu0 %1921 }
 0x3e6   : > { %v1927_v37 = vsel %vm1925_vm6, %v1922_v35, %v1920_v34  ;;  %v1926_v39 = vsel %vm1925_vm6, %v1920_v34, %v1922_v35 }
 0x3e7   : > { %v1928_v38 = vadd.f32 %v1927_v37, %v1911_v27  ;;  %v1929_v40 = vadd.f32 %v1926_v39, %v1918_v30 }
 0x3e9   : > { %1930 = vrot.lane.b32.xlu1 %v1928_v38, %s2916_s20 }
 0x3ed   : > { %1932 = vrot.lane.b32.xlu1 %v1929_v40, %s2916_s20 }
 0x45b   : > { %v1931_v41 = vpop.permute.xlu1 %1930 }
 0x45f   : > { %v1933_v44 = vpop.permute.xlu1 %1932 }
 0x460   : > { %v1935_v45 = vsel %vm1934_vm7, %v1931_v41, %v1933_v44  ;;  %v1936_v46 = vsel %vm1934_vm7, %v1933_v44, %v1931_v41 }
 0x461   : > { %v1937_v47 = vadd.f32 %v1936_v46, %v1928_v38  ;;  %v1938_v42 = vadd.f32 %v1935_v45, %v1929_v40  ;;  %v2746_v45 = vld [vmem:[%s3149_s22] sm:$0xff] }
 0x463   : > { %1939 = vrot.lane.b32.xlu0 %v1937_v47, %s2917_s21  ;;  %1941 = vrot.lane.b32.xlu1 %v1938_v42, %s2917_s21  ;;  %s2354_s21 = sshll.u32 %s2992_s13, 9 }
 0x464   : > { %s3297_s13 = scalar_lea.hbm %s3355_s9, %s2354_s21 }
 0x4d5   : > { %v1940_v28 = vpop.permute.xlu0 %1939  ;;  %v1942_v48 = vpop.permute.xlu1 %1941 }
 0x4d6   : > { %v1944_v49 = vsel %vm1943_vm8, %v1940_v28, %v1942_v48  ;;  %v1945_v50 = vsel %vm1943_vm8, %v1942_v48, %v1940_v28 }
 0x4d7   : > { %v1946_v51 = vadd.f32 %v1945_v50, %v1937_v47  ;;  %v1947_v53 = vadd.f32 %v1944_v49, %v1938_v42  ;;  %v2747_v47 = vld [vmem:[%s3149_s22 + $0x10] sm:$0xff] }
 0x4d9   : > { %v1948_v36 = vadd.f32 %v1947_v53, %v1946_v51 }
 0x4db   : > { %v1949_v54 = vmul.f32 0.00390625, %v1948_v36 }
 0x4dd   : > { %v1954_v56 = vrot.slane %v1949_v54, %v3206_v29 }
 0x4df   : > { %v1955_v15 = vmul.f32 %v1954_v56, %v1950_v55 }
 0x4e1   : > { %v1957_v32 = vsel %vm1956_vm9, %v1955_v15, 0.0 }
 0x4e2   : > { %1958 = vadd.xlane.f32.xlu0 %v1957_v32 }
 0x56f   : > { %v1959_v59 = vpop.xlane.xlu0 %1958 }
 0x570   : > { %v1961_v61 = vadd.f32 %v1960_v58, %v1959_v59 }
 0x572   : > { %v1962_v62 = vmax.f32 %v1961_v61, 0.0 }
 0x574   : > { %1966 = vperm.xlu1 %2447, %v1962_v62  }
 0x5f3   : > { %v1967_v1 = vpop.permute.xlu1 %1966 }
 0x5f4   : > { %v1972_v2 = vmul.f32 %v1967_v1, %v1963_v63  ;;  %v1973_v3 = vmul.f32 %v1970_v0, %v1967_v1 }
 0x5f6   : > { %v1975_v4 = vsel %vm1974_vm10, %v1972_v2, 0.0  ;;  %v1982_v5 = vsel %vm1974_vm10, %v1973_v3, 0.0 }
 0x5f7   : > { %v1976_v6 = vrot.slane %v1975_v4, 4  ;;  %v1983_v7 = vrot.slane %v1982_v5, 4 }
 0x5f9   : > { %v1977_v8 = vadd.f32 %v1976_v6, %v1975_v4  ;;  %v1984_v9 = vadd.f32 %v1983_v7, %v1982_v5 }
 0x5fb   : > { %v1978_v10 = vrot.slane %v1977_v8, 2  ;;  %v1985_v11 = vrot.slane %v1984_v9, 2 }
 0x5fd   : > { %v1979_v60 = vadd.f32 %v1978_v10, %v1977_v8  ;;  %v1986_v17 = vadd.f32 %v1985_v11, %v1984_v9 }
 0x5ff   : > { %v1980_v20 = vrot.slane %v1979_v60, 1  ;;  %v1987_v21 = vrot.slane %v1986_v17, 1 }
 0x601   : > { %v1981_v22 = vadd.f32 %v1980_v20, %v1979_v60  ;;  %v1988_v23 = vadd.f32 %v1987_v21, %v1986_v17 }
 0x603   : > { %v2001_v24 = vadd.f32 %v1994_v18, %v1981_v22  ;;  %v2002_v25 = vadd.f32 %v1998_v19, %v1988_v23 }
 0x605   : > { %v2346_v26 = vmul.f32 -1.442695, %v2001_v24  ;;  %v2347_v27 = vmul.f32 -1.442695, %v2002_v25 }
 0x607   : > { %2738 = vpow2.f32 %v2346_v26 }
 0x608   : > { %2740 = vpow2.f32 %v2347_v27 }
 0x611   : > { %v2739_v43 = vpop.eup %2738 }
 0x612   : > { %v2741_v30 = vpop.eup %2740  ;;  %v2009_v33 = vadd.f32 1.0, %v2739_v43 }
 0x613   : > { %v2010_v34 = vadd.f32 1.0, %v2741_v30 }
 0x614   : > { %2742 = vrcp.f32 %v2009_v33 }
 0x615   : > { %2744 = vrcp.f32 %v2010_v34 }
 0x61e   : > { %v2743_v31 = vpop.eup %2742 }
 0x61f   : > { %v2745_v35 = vpop.eup %2744  ;;  %v2018_v37 = vrot.slane %v2743_v31, %v3206_v29 }
 0x620   : > { %v2022_v38 = vrot.slane %v2745_v35, %v3206_v29  ;;  %v2748_v29 = vld [vmem:[%s3149_s22 + $0x8] sm:$0xff] }
 0x621   : > { %v2023_v39 = vmul.f32 %v2018_v37, %v3253_v12  ;;  %v2025_v40 = vmul.f32 %v2018_v37, %v3255_v13  ;;  %v2749_v13 = vld [vmem:[%s3149_s22 + $0x18] sm:$0xff]  ;;  %s2842_s22 = scalar_lea.vmem %s2841_s16, 1024 }
 0x622   : > { %v2024_v41 = vmul.f32 %v2022_v38, %v3257_v16  ;;  %v2026_v44 = vmul.f32 %v2022_v38, %v3259_v52  ;;  %p2844_p9 = scmp.lt.s32.totalorder %s2842_s22, %s2836_s17 }
 0x623   : > { %v2027_v46 = vadd.f32 %v2746_v45, %v2023_v39  ;;  %v2029_v42 = vadd.f32 %v2747_v47, %v2025_v40 }
 0x624   : > { %v2028_v12 = vadd.f32 %v2748_v29, %v2024_v41  ;;  %v2030_v28 = vadd.f32 %v2749_v13, %v2026_v44  ;;  %p2845_p12 = por %p2844_p9, %p2843_p7 }
 0x625   : > { %2031 = vst [vmem:[%s379_s25] sm:$0xff] %v2027_v46  ;;  %2033 = vst [vmem:[%s379_s25 + $0x10] sm:$0xff] %v2029_v42 }
 0x626   : > { %2032 = vst [vmem:[%s379_s25 + $0x8] sm:$0xff] %v2028_v12  ;;  %2034 = vst [vmem:[%s379_s25 + $0x18] sm:$0xff] %v2030_v28  ;;  %p2846_p2 = pnand %p2845_p12, %p2839_p3 }
 0x628   : > { %2849 = shalt.err (!%p2846_p2)
}
 0x629   : > { %s2850_s20 = scalar_lea.hbm %s3297_s13, 512  ;;  %s2854_s29 = scalar_lea.hbm %s3355_s9, 1024 }
 0x62a   : > { %p2851_p13 = scmp.ne.s32.totalorder %s3297_s13, %s2850_s20  ;;  %p2855_p4 = scmp.lt.u32.totalorder %s3297_s13, %s3355_s9 }
 0x62b   : > { %p2856_p5 = scmp.lt.u32.totalorder %s2854_s29, %s2850_s20  ;;  %p2858_p11 = scmp.lt.u32.totalorder %s2850_s20, %s3297_s13 }
 0x62c   : > { %p2852_p6 = pnand %p2851_p13, %p3375_p0 }
 0x62d   : > { %p2857_p8 = por %p2856_p5, %p2855_p4 }
 0x62e   : > { %p2853_p10 = pneg %p2852_p6 }
 0x62f   : > { %p2859_p1 = por %p2858_p11, %p2857_p8 }
 0x631   : > { %p2860_p3 = pnand %p2859_p1, %p2853_p10 }
 0x633   : > { %2863 = shalt.err (!%p2860_p3)
}
 0x634   : > { %s2920_s17 = smov 256  }
 0x635   : > { %2381 = dma.vmem_to_hbm [thread:$0]  (%p3375_p0), %s3301_s18, 512, %s3297_s13, %s2036_s28, %s2920_s17, %s2920_s17, %s2915_s23  }
 0x636 PF: > { %s3376_s16 = sld [smem:[#allocation12_spill]]  ;;  %s2064_s22 = sand.u32 1, %s2894_s30  }
 0x637   : > { %p3378_p9 = scmp.ge.s32.totalorder %s2906_s12, 2  ;;  %s2065_s20 = scalar_lea.sflag [#allocation4], %s2064_s22 }
 0x63c   : > { %p3377_p7 = scmp.ne.s32.totalorder %s3376_s16, 0 }
 0x63e   : > { %p2395_p12 = pnand %p3378_p9, %p3377_p7 }
 0x640   : > { %2889 = dma.done.wait (!%p2395_p12), %s2065_s20, 512  }
 0x641   : > { %2891 = vsyncadd (!%p2395_p12), %s2065_s20, 4294966784  ;;  %p23_p2 = scmp.ge.s32.totalorder %s3081_s24, 4   ;;  %s3379_s30 = smov %s2898_s10 }
 0x642   : > { %s3380_s10 = smov %s2902_s11  ;;  %s3381_s11 = smov %s3097_s27 }
 0x643   : > { %s3382_s12 = smov %s3081_s24  ;;  %25 = sbr.rel (!%p23_p2) target bundleno = 6 (0x6), region = 113 }
 0x64a   :  { %2070 = vsyncpa [#allocation3], 1 }
 0x64b   :  { %2072 = vsyncpa [#allocation3 + $0x1], 1 }
 0x64c   :  { %2073 = vsyncpa [#allocation6], 1 }
 0x64d   :  { %2074 = vsyncpa [#allocation4], 1 }
 0x64e   :  { %2076 = vsyncpa [#allocation4 + $0x1], 1 }

</bundles_post_ra>
